<compile_context>
chip_gen: v7x
topology: tpu7x:2x2x1
jax: 0.10.0
libtpu: 0.0.40
codegen_flags: <defaults>
</compile_context>

<pallas_src>
import functools

import jax
import jax.numpy as jnp
from jax.experimental import pallas as pl
from jax.experimental.pallas import tpu as pltpu


def conv_bn_relu_kernel(x_ref, w_ref, b_ref, o_ref, *,
                        KH, KW, OH, OW, stride, apply_relu):
    """Fused conv (in-kernel im2col) + BN bias + ReLU for one image.

    x_ref: (1, Hp, Wp, Cin)   bf16  padded NHWC input image
    w_ref: (KH*KW, Cin, Cp)   bf16  conv weight with BN scale folded in
    b_ref: (1, Cp)            f32   BN bias (beta - mean*scale), lane-padded
    o_ref: (1, OH*OW, Cp)     f32   output plane, lane-padded channels
    """
    acc = None
    for i in range(KH):
        for j in range(KW):
            if stride == 1:
                xs = x_ref[0, i:i + OH, j:j + OW, :]
            else:
                xs = x_ref[0, pl.ds(i, OH, stride), pl.ds(j, OW, stride), :]
            xs = xs.reshape(OH * OW, xs.shape[-1])
            part = jnp.dot(xs, w_ref[i * KW + j],
                           preferred_element_type=jnp.float32)
            acc = part if acc is None else acc + part
    y = acc + b_ref[...]                      # per-output-channel affine (BN)
    if apply_relu:
        y = jnp.maximum(y, 0.0)
    o_ref[0] = y.astype(o_ref.dtype)


def basic_conv2d(x_nchw, weight, gamma, beta, run_mean, run_var, *,
                 stride=1, padding=0, apply_relu=True, eps=1e-5):
    """Forward pass of BasicConv2d.  x_nchw: (N, Cin, H, W) float32."""
    N, Cin, H, W = x_nchw.shape
    Cout, _, KH, KW = weight.shape
    OH = (H + 2 * padding - KH) // stride + 1
    OW = (W + 2 * padding - KW) // stride + 1
    Hp, Wp = H + 2 * padding, W + 2 * padding

    # NCHW -> NHWC + spatial zero pad (layout glue required by the NCHW API).
    x = jnp.transpose(x_nchw, (0, 2, 3, 1))
    if padding:
        x = jnp.pad(x, ((0, 0), (padding, padding), (padding, padding), (0, 0)))
    x = x.astype(jnp.bfloat16)

    # Fold eval-mode BatchNorm into the conv weight / a per-channel bias.
    scale = gamma / jnp.sqrt(run_var + eps)                 # (Cout,)
    bias = beta - run_mean * scale                          # (Cout,)

    # weight (Cout,Cin,KH,KW) -> (KH*KW, Cin, Cout), scale folded, lane-padded
    # to a multiple of 128 output channels for dense stores / MXU occupancy.
    Cp = ((Cout + 127) // 128) * 128
    w = jnp.transpose(weight, (2, 3, 1, 0)).reshape(KH * KW, Cin, Cout)
    w = w * scale[None, None, :]
    w = jnp.pad(w, ((0, 0), (0, 0), (0, Cp - Cout))).astype(jnp.bfloat16)
    b = jnp.pad(bias, (0, Cp - Cout)).reshape(1, Cp).astype(jnp.float32)

    kernel = functools.partial(conv_bn_relu_kernel, KH=KH, KW=KW, OH=OH,
                               OW=OW, stride=stride, apply_relu=apply_relu)

    out = pl.pallas_call(
        kernel,
        out_shape=jax.ShapeDtypeStruct((N, OH * OW, Cp), jnp.float32),
        grid_spec=pltpu.PrefetchScalarGridSpec(
            num_scalar_prefetch=0,
            grid=(N,),
            in_specs=[
                pl.BlockSpec((1, Hp, Wp, Cin), lambda n: (n, 0, 0, 0)),  # image
                pl.BlockSpec((KH * KW, Cin, Cp), lambda n: (0, 0, 0)),   # weights
                pl.BlockSpec((1, Cp), lambda n: (0, 0)),                 # BN bias
            ],
            out_specs=pl.BlockSpec((1, OH * OW, Cp), lambda n: (n, 0, 0)),
        ),
        compiler_params=pltpu.CompilerParams(
            dimension_semantics=("parallel",)),
    )(x, w, b)

    out = out[:, :, :Cout].reshape(N, OH, OW, Cout)
    return jnp.transpose(out, (0, 3, 1, 2)).astype(x_nchw.dtype)   # back to NCHW


if __name__ == "__main__":
    # Module config: BasicConv2d(in_planes=4, out_planes=8, kernel_size=3,
    #                            stride=1, padding=1, apply_relu=True)
    N, Cin, H, W = 2, 4, 16, 16
    Cout, KH, KW = 8, 3, 3
    stride, padding = 1, 1

    key = jax.random.PRNGKey(0)
    kx, kw, kg, kb, km, kv = jax.random.split(key, 6)

    x = jax.random.normal(kx, (N, Cin, H, W), dtype=jnp.float32)
    weight = jax.random.normal(kw, (Cout, Cin, KH, KW), dtype=jnp.float32) * 0.1
    gamma = 1.0 + 0.1 * jax.random.normal(kg, (Cout,), dtype=jnp.float32)
    beta = 0.1 * jax.random.normal(kb, (Cout,), dtype=jnp.float32)
    run_mean = 0.1 * jax.random.normal(km, (Cout,), dtype=jnp.float32)
    run_var = jnp.abs(jax.random.normal(kv, (Cout,), dtype=jnp.float32)) + 0.5

    y = basic_conv2d(x, weight, gamma, beta, run_mean, run_var,
                     stride=stride, padding=padding, apply_relu=True)
    y = jax.block_until_ready(y)
    assert y.shape == (N, Cout, H, W)

    eps = 1e-5
    scale = gamma / jnp.sqrt(run_var + eps)
    bias = beta - run_mean * scale

    # Reference 1: matched numerics (BN folded into weight, bf16 operands,
    # f32 accumulation) -> tight tolerance validates the kernel logic.
    w_folded = (weight * scale.reshape(Cout, 1, 1, 1)).astype(jnp.bfloat16)
    y_ref = jax.lax.conv_general_dilated(
        x.astype(jnp.bfloat16), w_folded,
        window_strides=(stride, stride),
        padding=((padding, padding), (padding, padding)),
        dimension_numbers=("NCHW", "OIHW", "NCHW"),
        preferred_element_type=jnp.float32)
    y_ref = jnp.maximum(y_ref + bias.reshape(1, Cout, 1, 1), 0.0)
    assert jnp.max(jnp.abs(y - y_ref)) < 2e-3, "mismatch vs bf16 reference"

    # Reference 2: full-f32 conv + BN(eval) + ReLU, loose tol for bf16 inputs.
    y_f32 = jax.lax.conv_general_dilated(
        x, weight, window_strides=(stride, stride),
        padding=((padding, padding), (padding, padding)),
        dimension_numbers=("NCHW", "OIHW", "NCHW"))
    y_f32 = jnp.maximum(y_f32 * scale.reshape(1, Cout, 1, 1)
                        + bias.reshape(1, Cout, 1, 1), 0.0)
    assert jnp.max(jnp.abs(y - y_f32)) < 5e-2, "mismatch vs f32 reference"

    print("KERNEL_OK")
</pallas_src>

<mosaic_0001>
module attributes {stable_mosaic.version = 11 : i64} {
  func.func @conv_bn_relu_kernel(%arg0: i32, %arg1: memref<1x18x18x4xbf16, #tpu.memory_space<vmem>>, %arg2: memref<9x4x128xbf16, #tpu.memory_space<vmem>>, %arg3: memref<1x128xf32, #tpu.memory_space<vmem>>, %arg4: memref<1x256x128xf32, #tpu.memory_space<vmem>>) attributes {dimension_semantics = [#tpu.dimension_semantics<parallel>], iteration_bounds = array<i64: 2>, scalar_prefetch = 0 : i64, scratch_operands = 0 : i64, tpu.core_type = #tpu.core_type<tc>, window_params = [{transform_indices = @transform_0, window_bounds = array<i64: 1, 18, 18, 4>}, {pipeline_mode = #tpu.pipeline_mode<synchronous>, transform_indices = @transform_1, window_bounds = array<i64: 9, 4, 128>}, {pipeline_mode = #tpu.pipeline_mode<synchronous>, transform_indices = @transform_2, window_bounds = array<i64: 1, 128>}, {transform_indices = @transform_3, window_bounds = array<i64: 1, 256, 128>}]} {
    %c0 = arith.constant 0 : index
    %c0_0 = arith.constant 0 : index
    %c0_1 = arith.constant 0 : index
    %c0_2 = arith.constant 0 : index
    %0 = vector.load %arg1[%c0, %c0_0, %c0_1, %c0_2] : memref<1x18x18x4xbf16, #tpu.memory_space<vmem>>, vector<1x16x16x4xbf16>
    %1 = vector.shape_cast %0 : vector<1x16x16x4xbf16> to vector<16x16x4xbf16>
    %2 = vector.shape_cast %1 : vector<16x16x4xbf16> to vector<256x4xbf16>
    %c0_3 = arith.constant 0 : index
    %c0_4 = arith.constant 0 : index
    %c0_5 = arith.constant 0 : index
    %3 = vector.load %arg2[%c0_3, %c0_4, %c0_5] : memref<9x4x128xbf16, #tpu.memory_space<vmem>>, vector<1x4x128xbf16>
    %4 = vector.shape_cast %3 : vector<1x4x128xbf16> to vector<4x128xbf16>
    %cst = arith.constant dense<0.000000e+00> : vector<256x128xf32>
    %5 = tpu.matmul %2, %4, %cst {dimension_numbers = #tpu.dot_dimension_numbers<[1], [0], [0], [1], [0, 0, 1, 1], [], []>} : vector<256x4xbf16>, vector<4x128xbf16>, vector<256x128xf32> -> vector<256x128xf32>
    %c0_6 = arith.constant 0 : index
    %c0_7 = arith.constant 0 : index
    %c1 = arith.constant 1 : index
    %c0_8 = arith.constant 0 : index
    %6 = vector.load %arg1[%c0_6, %c0_7, %c1, %c0_8] : memref<1x18x18x4xbf16, #tpu.memory_space<vmem>>, vector<1x16x16x4xbf16>
    %7 = vector.shape_cast %6 : vector<1x16x16x4xbf16> to vector<16x16x4xbf16>
    %8 = vector.shape_cast %7 : vector<16x16x4xbf16> to vector<256x4xbf16>
    %c1_9 = arith.constant 1 : index
    %c0_10 = arith.constant 0 : index
    %c0_11 = arith.constant 0 : index
    %9 = vector.load %arg2[%c1_9, %c0_10, %c0_11] : memref<9x4x128xbf16, #tpu.memory_space<vmem>>, vector<1x4x128xbf16>
    %10 = vector.shape_cast %9 : vector<1x4x128xbf16> to vector<4x128xbf16>
    %cst_12 = arith.constant dense<0.000000e+00> : vector<256x128xf32>
    %11 = tpu.matmul %8, %10, %cst_12 {dimension_numbers = #tpu.dot_dimension_numbers<[1], [0], [0], [1], [0, 0, 1, 1], [], []>} : vector<256x4xbf16>, vector<4x128xbf16>, vector<256x128xf32> -> vector<256x128xf32>
    %12 = arith.addf %5, %11 : vector<256x128xf32>
    %c0_13 = arith.constant 0 : index
    %c0_14 = arith.constant 0 : index
    %c2 = arith.constant 2 : index
    %c0_15 = arith.constant 0 : index
    %13 = vector.load %arg1[%c0_13, %c0_14, %c2, %c0_15] : memref<1x18x18x4xbf16, #tpu.memory_space<vmem>>, vector<1x16x16x4xbf16>
    %14 = vector.shape_cast %13 : vector<1x16x16x4xbf16> to vector<16x16x4xbf16>
    %15 = vector.shape_cast %14 : vector<16x16x4xbf16> to vector<256x4xbf16>
    %c2_16 = arith.constant 2 : index
    %c0_17 = arith.constant 0 : index
    %c0_18 = arith.constant 0 : index
    %16 = vector.load %arg2[%c2_16, %c0_17, %c0_18] : memref<9x4x128xbf16, #tpu.memory_space<vmem>>, vector<1x4x128xbf16>
    %17 = vector.shape_cast %16 : vector<1x4x128xbf16> to vector<4x128xbf16>
    %cst_19 = arith.constant dense<0.000000e+00> : vector<256x128xf32>
    %18 = tpu.matmul %15, %17, %cst_19 {dimension_numbers = #tpu.dot_dimension_numbers<[1], [0], [0], [1], [0, 0, 1, 1], [], []>} : vector<256x4xbf16>, vector<4x128xbf16>, vector<256x128xf32> -> vector<256x128xf32>
    %19 = arith.addf %12, %18 : vector<256x128xf32>
    %c0_20 = arith.constant 0 : index
    %c1_21 = arith.constant 1 : index
    %c0_22 = arith.constant 0 : index
    %c0_23 = arith.constant 0 : index
    %20 = vector.load %arg1[%c0_20, %c1_21, %c0_22, %c0_23] : memref<1x18x18x4xbf16, #tpu.memory_space<vmem>>, vector<1x16x16x4xbf16>
    %21 = vector.shape_cast %20 : vector<1x16x16x4xbf16> to vector<16x16x4xbf16>
    %22 = vector.shape_cast %21 : vector<16x16x4xbf16> to vector<256x4xbf16>
    %c3 = arith.constant 3 : index
    %c0_24 = arith.constant 0 : index
    %c0_25 = arith.constant 0 : index
    %23 = vector.load %arg2[%c3, %c0_24, %c0_25] : memref<9x4x128xbf16, #tpu.memory_space<vmem>>, vector<1x4x128xbf16>
    %24 = vector.shape_cast %23 : vector<1x4x128xbf16> to vector<4x128xbf16>
    %cst_26 = arith.constant dense<0.000000e+00> : vector<256x128xf32>
    %25 = tpu.matmul %22, %24, %cst_26 {dimension_numbers = #tpu.dot_dimension_numbers<[1], [0], [0], [1], [0, 0, 1, 1], [], []>} : vector<256x4xbf16>, vector<4x128xbf16>, vector<256x128xf32> -> vector<256x128xf32>
    %26 = arith.addf %19, %25 : vector<256x128xf32>
    %c0_27 = arith.constant 0 : index
    %c1_28 = arith.constant 1 : index
    %c1_29 = arith.constant 1 : index
    %c0_30 = arith.constant 0 : index
    %27 = vector.load %arg1[%c0_27, %c1_28, %c1_29, %c0_30] : memref<1x18x18x4xbf16, #tpu.memory_space<vmem>>, vector<1x16x16x4xbf16>
    %28 = vector.shape_cast %27 : vector<1x16x16x4xbf16> to vector<16x16x4xbf16>
    %29 = vector.shape_cast %28 : vector<16x16x4xbf16> to vector<256x4xbf16>
    %c4 = arith.constant 4 : index
    %c0_31 = arith.constant 0 : index
    %c0_32 = arith.constant 0 : index
    %30 = vector.load %arg2[%c4, %c0_31, %c0_32] : memref<9x4x128xbf16, #tpu.memory_space<vmem>>, vector<1x4x128xbf16>
    %31 = vector.shape_cast %30 : vector<1x4x128xbf16> to vector<4x128xbf16>
    %cst_33 = arith.constant dense<0.000000e+00> : vector<256x128xf32>
    %32 = tpu.matmul %29, %31, %cst_33 {dimension_numbers = #tpu.dot_dimension_numbers<[1], [0], [0], [1], [0, 0, 1, 1], [], []>} : vector<256x4xbf16>, vector<4x128xbf16>, vector<256x128xf32> -> vector<256x128xf32>
    %33 = arith.addf %26, %32 : vector<256x128xf32>
    %c0_34 = arith.constant 0 : index
    %c1_35 = arith.constant 1 : index
    %c2_36 = arith.constant 2 : index
    %c0_37 = arith.constant 0 : index
    %34 = vector.load %arg1[%c0_34, %c1_35, %c2_36, %c0_37] : memref<1x18x18x4xbf16, #tpu.memory_space<vmem>>, vector<1x16x16x4xbf16>
    %35 = vector.shape_cast %34 : vector<1x16x16x4xbf16> to vector<16x16x4xbf16>
    %36 = vector.shape_cast %35 : vector<16x16x4xbf16> to vector<256x4xbf16>
    %c5 = arith.constant 5 : index
    %c0_38 = arith.constant 0 : index
    %c0_39 = arith.constant 0 : index
    %37 = vector.load %arg2[%c5, %c0_38, %c0_39] : memref<9x4x128xbf16, #tpu.memory_space<vmem>>, vector<1x4x128xbf16>
    %38 = vector.shape_cast %37 : vector<1x4x128xbf16> to vector<4x128xbf16>
    %cst_40 = arith.constant dense<0.000000e+00> : vector<256x128xf32>
    %39 = tpu.matmul %36, %38, %cst_40 {dimension_numbers = #tpu.dot_dimension_numbers<[1], [0], [0], [1], [0, 0, 1, 1], [], []>} : vector<256x4xbf16>, vector<4x128xbf16>, vector<256x128xf32> -> vector<256x128xf32>
    %40 = arith.addf %33, %39 : vector<256x128xf32>
    %c0_41 = arith.constant 0 : index
    %c2_42 = arith.constant 2 : index
    %c0_43 = arith.constant 0 : index
    %c0_44 = arith.constant 0 : index
    %41 = vector.load %arg1[%c0_41, %c2_42, %c0_43, %c0_44] : memref<1x18x18x4xbf16, #tpu.memory_space<vmem>>, vector<1x16x16x4xbf16>
    %42 = vector.shape_cast %41 : vector<1x16x16x4xbf16> to vector<16x16x4xbf16>
    %43 = vector.shape_cast %42 : vector<16x16x4xbf16> to vector<256x4xbf16>
    %c6 = arith.constant 6 : index
    %c0_45 = arith.constant 0 : index
    %c0_46 = arith.constant 0 : index
    %44 = vector.load %arg2[%c6, %c0_45, %c0_46] : memref<9x4x128xbf16, #tpu.memory_space<vmem>>, vector<1x4x128xbf16>
    %45 = vector.shape_cast %44 : vector<1x4x128xbf16> to vector<4x128xbf16>
    %cst_47 = arith.constant dense<0.000000e+00> : vector<256x128xf32>
    %46 = tpu.matmul %43, %45, %cst_47 {dimension_numbers = #tpu.dot_dimension_numbers<[1], [0], [0], [1], [0, 0, 1, 1], [], []>} : vector<256x4xbf16>, vector<4x128xbf16>, vector<256x128xf32> -> vector<256x128xf32>
    %47 = arith.addf %40, %46 : vector<256x128xf32>
    %c0_48 = arith.constant 0 : index
    %c2_49 = arith.constant 2 : index
    %c1_50 = arith.constant 1 : index
    %c0_51 = arith.constant 0 : index
    %48 = vector.load %arg1[%c0_48, %c2_49, %c1_50, %c0_51] : memref<1x18x18x4xbf16, #tpu.memory_space<vmem>>, vector<1x16x16x4xbf16>
    %49 = vector.shape_cast %48 : vector<1x16x16x4xbf16> to vector<16x16x4xbf16>
    %50 = vector.shape_cast %49 : vector<16x16x4xbf16> to vector<256x4xbf16>
    %c7 = arith.constant 7 : index
    %c0_52 = arith.constant 0 : index
    %c0_53 = arith.constant 0 : index
    %51 = vector.load %arg2[%c7, %c0_52, %c0_53] : memref<9x4x128xbf16, #tpu.memory_space<vmem>>, vector<1x4x128xbf16>
    %52 = vector.shape_cast %51 : vector<1x4x128xbf16> to vector<4x128xbf16>
    %cst_54 = arith.constant dense<0.000000e+00> : vector<256x128xf32>
    %53 = tpu.matmul %50, %52, %cst_54 {dimension_numbers = #tpu.dot_dimension_numbers<[1], [0], [0], [1], [0, 0, 1, 1], [], []>} : vector<256x4xbf16>, vector<4x128xbf16>, vector<256x128xf32> -> vector<256x128xf32>
    %54 = arith.addf %47, %53 : vector<256x128xf32>
    %c0_55 = arith.constant 0 : index
    %c2_56 = arith.constant 2 : index
    %c2_57 = arith.constant 2 : index
    %c0_58 = arith.constant 0 : index
    %55 = vector.load %arg1[%c0_55, %c2_56, %c2_57, %c0_58] : memref<1x18x18x4xbf16, #tpu.memory_space<vmem>>, vector<1x16x16x4xbf16>
    %56 = vector.shape_cast %55 : vector<1x16x16x4xbf16> to vector<16x16x4xbf16>
    %57 = vector.shape_cast %56 : vector<16x16x4xbf16> to vector<256x4xbf16>
    %c8 = arith.constant 8 : index
    %c0_59 = arith.constant 0 : index
    %c0_60 = arith.constant 0 : index
    %58 = vector.load %arg2[%c8, %c0_59, %c0_60] : memref<9x4x128xbf16, #tpu.memory_space<vmem>>, vector<1x4x128xbf16>
    %59 = vector.shape_cast %58 : vector<1x4x128xbf16> to vector<4x128xbf16>
    %cst_61 = arith.constant dense<0.000000e+00> : vector<256x128xf32>
    %60 = tpu.matmul %57, %59, %cst_61 {dimension_numbers = #tpu.dot_dimension_numbers<[1], [0], [0], [1], [0, 0, 1, 1], [], []>} : vector<256x4xbf16>, vector<4x128xbf16>, vector<256x128xf32> -> vector<256x128xf32>
    %61 = arith.addf %54, %60 : vector<256x128xf32>
    %c0_62 = arith.constant 0 : index
    %c0_63 = arith.constant 0 : index
    %62 = vector.load %arg3[%c0_62, %c0_63] : memref<1x128xf32, #tpu.memory_space<vmem>>, vector<1x128xf32>
    %63 = vector.broadcast %62 : vector<1x128xf32> to vector<256x128xf32>
    %64 = arith.addf %61, %63 : vector<256x128xf32>
    %cst_64 = arith.constant 0.000000e+00 : f32
    %65 = vector.broadcast %cst_64 : f32 to vector<256x128xf32>
    %66 = arith.maximumf %64, %65 : vector<256x128xf32>
    %c0_65 = arith.constant 0 : index
    %c0_66 = arith.constant 0 : index
    %c0_67 = arith.constant 0 : index
    %67 = vector.load %arg4[%c0_65, %c0_66, %c0_67] : memref<1x256x128xf32, #tpu.memory_space<vmem>>, vector<1x256x128xf32>
    %68 = vector.shape_cast %67 : vector<1x256x128xf32> to vector<256x128xf32>
    %69 = vector.shape_cast %66 : vector<256x128xf32> to vector<1x256x128xf32>
    tpu.vector_store %arg4[%c0_65, %c0_66, %c0_67], %69 {strides = array<i32>} : memref<1x256x128xf32, #tpu.memory_space<vmem>>, vector<1x256x128xf32>,
    return
  }
  func.func @transform_0(%arg0: i32) -> (i32, i32, i32, i32) {
    %c0_i32 = arith.constant 0 : i32
    %c0_i32_0 = arith.constant 0 : i32
    %c0_i32_1 = arith.constant 0 : i32
    %c0_i32_2 = arith.constant 0 : i32
    return %arg0, %c0_i32, %c0_i32_0, %c0_i32_1 : i32, i32, i32, i32
  }
  func.func @transform_1(%arg0: i32) -> (i32, i32, i32) {
    %c0_i32 = arith.constant 0 : i32
    %c0_i32_0 = arith.constant 0 : i32
    %c0_i32_1 = arith.constant 0 : i32
    %c0_i32_2 = arith.constant 0 : i32
    return %c0_i32, %c0_i32_0, %c0_i32_1 : i32, i32, i32
  }
  func.func @transform_2(%arg0: i32) -> (i32, i32) {
    %c0_i32 = arith.constant 0 : i32
    %c0_i32_0 = arith.constant 0 : i32
    %c0_i32_1 = arith.constant 0 : i32
    return %c0_i32, %c0_i32_0 : i32, i32
  }
  func.func @transform_3(%arg0: i32) -> (i32, i32, i32) {
    %c0_i32 = arith.constant 0 : i32
    %c0_i32_0 = arith.constant 0 : i32
    %c0_i32_1 = arith.constant 0 : i32
    return %arg0, %c0_i32, %c0_i32_0 : i32, i32, i32
  }
}

</mosaic_0001>

<bundles_post_ra>
// kernel: tpu_custom_call.1
= control target key start
LH: loop header
LB: loop body
LE: loop exit
PB: predicated region body
PF: predicated region fallthrough
CT: control target
= control target key end

     0   :  { %8 = vsyncpa [#allocation3], 0  ;;  %s8306_s0 = inlined_call_operand.vmem [shape: bf16[2,18,18,4], index: 0, kind: input, shape index: {}]   ;;  %s8307_s1 = inlined_call_operand.vmem [shape: bf16[9,4,128], index: 1, kind: input, shape index: {}]   ;;  %s8308_s2 = inlined_call_operand.vmem [shape: f32[1,128], index: 2, kind: input, shape index: {}]   ;;  %s8309_s3 = inlined_call_operand.hbm [shape: f32[2,256,128], index: 3, kind: output, shape index: {}]  }
   0x1   :  { %10 = vsyncpa [#allocation3 + $0x1], 0  ;;  %s6418_s12 = smov 0   ;;  %s6420_s13 = smov 0  }
   0x2   :  { %s6422_s14 = smov 0   ;;  %s6424_s15 = smov 0  }
   0x3 LB: > { %s6439_s16 = sadd.s32 4294967295, %s6393_s15   ;;  %s4908_s17 = sadd.s32 4294967294, %s6393_s15   ;;  %s6393_s15 = sphi %s6424_s15, %s8382_s15   ;;  %s6389_s14 = sphi %s6422_s14, %s8381_s14   ;;  %s6385_s13 = sphi %s6420_s13, %s8380_s13   ;;  %s6381_s12 = sphi %s6418_s12, %s8379_s12  }
   0x4   : > { %s6443_s18 = sadd.s32 1, %s6393_s15   ;;  %s91_s19 = sadd.s32 1, %s6389_s14 }
   0x5   : > { %s88_s20 = ssub.s32 %s6393_s15, %s6443_s18  ;;  %p101_p0 = scmp.ne.s32.totalorder %s6389_s14, %s6385_s13 }
   0x6   : > { %p89_p1 = scmp.eq.s32.totalorder %s88_s20, 0  ;;  %p102_p2 = scmp.eq.s32.totalorder %s6439_s16, 1 }
   0x7   : > { %p107_p3 = scmp.ne.s32.totalorder %s6385_s13, %s6381_s12  ;;  %p108_p4 = scmp.eq.s32.totalorder %s4908_s17, 1 }
   0x8   : > { %s6454_s21 = scalar_select %p89_p1, %s6389_s14, %s91_s19  }
   0x9   : > { %p6456_p5 = por %p102_p2, %p101_p0  ;;  %p6460_p6 = por %p108_p4, %p107_p3 }
   0xa   : > { %p4911_p7 = scmp.ge.s32.totalorder %s6393_s15, 1  ;;  %p140_p8 = scmp.lt.s32.totalorder %s6393_s15, 3 }
   0xc   : > { %p141_p9 = pnand %p4911_p7, %p140_p8 }
   0xe   : > { %144 = sbr.rel (%p141_p9) target bundleno = 610 (0x262), region = 32 }
  0x15   : > { %v4914_v0 = vld [vmem:[%s8307_s1 + $0x2] sm:$0x3]  ;;  %vm705_vm0 = vcmask 1041408   ;;  %v5141_v1 = vld [vmem:[%s8307_s1 + $0x8] sm:$0x3]  ;;  %p164_p10 = scmp.lt.s32.totalorder %s6439_s16, 1 }
  0x16   : > { %6174 = vmatprep.subr.msk.bf16.mxu1 %vm705_vm0, %v4914_v0  ;;  %6178 = vmatprep.subr.msk.bf16.mxu0 %vm705_vm0, %v5141_v1  ;;  %v707_v2 = vsel %vm705_vm0, %v4914_v0, 0  ;;  %v6477_v3 = vsel %vm705_vm0, %v5141_v1, 0  ;;  %v202_v4 = vld [vmem:[%s8307_s1] sm:$0x3]  ;;  %v5206_v5 = vld [vmem:[%s8307_s1 + $0xa] sm:$0x3] }
  0x17   : > { %8325 = vst [vmem:[#allocation5_spill] sm:$0xff] %v6477_v3  ;;  %5611 = vmatpush3.bf16.msra.mxu1 %v707_v2  ;;  %5747 = vmatpush3.bf16.msra.mxu0 %v6477_v3  ;;  %s165_s28 = scalar_select %p164_p10, %s6439_s16, 1  ;;  %vm219_vm1 = vsmask.f32 3328  ;;  %vm220_vm2 = vsmask.f32 7440 }
  0x18   : > { %6175 = vmatprep.subr.msk.bf16.mxu1 %vm705_vm0, %v202_v4  ;;  %6180 = vmatprep.subr.msk.bf16.mxu0 %vm705_vm0, %v5206_v5  ;;  %vm656_vm3 = vcmask 31744   ;;  %v6505_v17 = vsel %vm705_vm0, %v202_v4, 0  ;;  %v6511_v26 = vld [vmem:[%s8307_s1 + $0xc] sm:$0x3]  ;;  %vm6518_vm4 = vmor %vm219_vm1, %vm220_vm2  ;;  %v6524_v37 = vsel %vm705_vm0, %v5206_v5, 0  ;;  %vm1210_vm5 = vcmask 1042432  }
  0x19   : > { %s6184_s6 = smul.u32 216, %s165_s28  ;;  %v6528_v41 = vsel %vm705_vm0, %v6511_v26, 0  ;;  %vm1211_vm6 = vcmask 1046532   ;;  %s5456_s11 = sshll.u32 %s6439_s16, 12 }
  0x1a   : > { %vm6744_vm7 = vmor %vm1210_vm5, %vm1211_vm6  ;;  %s8256_s24 = scalar_lea.hbm %s8309_s3, %s5456_s11  ;;  %s6395_s26 = smov [#allocation2]  }
  0x1b   : > { %s6492_s9 = scalar_lea.vmem %s8306_s0, %s6184_s6  ;;  %s161_s6 = sand.u32 1, %s6385_s13  }
  0x1c   : > { %v170_v6 = vld [vmem:[%s6492_s9] sm:$0xf]  ;;  %v171_v7 = vld [vmem:[%s6492_s9 + $0x4] sm:$0xf]  ;;  %v203_v8 = vld [vmem:[%s6492_s9 + $0x8] sm:$0x1] }
  0x1d   : > { %v223_v9 = vshrl.u32 %v170_v6, 16  ;;  %v226_v10 = vshll.u32 %v170_v6, 16  ;;  %v232_v11 = vshll.u32 %v171_v7, 16  ;;  %v236_v12 = vshrl.u32 %v171_v7, 16  ;;  %v5093_v13 = vld [vmem:[%s6492_s9 + $0xc] sm:$0xf] }
  0x1e   : > { %v242_v14 = vshll.u32 %v203_v8, 16  ;;  %v6499_v15 = vld [vmem:[%s6492_s9 + $0x10] sm:$0xf]  ;;  %v6502_v16 = vld [vmem:[%s6492_s9 + $0x14] sm:$0x1]  ;;  %v2027_v23 = vshrl.u32 %v5093_v13, 16 }
  0x1f   : > { %v225_v18 = vrot.slane %v223_v9, 4  ;;  %v228_v19 = vrot.slane %v226_v10, 5  ;;  %v234_v20 = vrot.slane %v232_v11, 5  ;;  %v238_v21 = vrot.slane %v236_v12, 4  ;;  %v172_v31 = vld [vmem:[%s6492_s9 + $0xc] sm:$0xf] }
  0x20   : > { %v244_v22 = vrot.slane %v242_v14, 5  ;;  %v2030_v24 = vshll.u32 %v5093_v13, 16  ;;  %v2036_v25 = vshll.u32 %v6499_v15, 16  ;;  %v2040_v29 = vshrl.u32 %v6499_v15, 16  ;;  %v173_v36 = vld [vmem:[%s6492_s9 + $0x10] sm:$0xf] }
  0x21   : > { %v229_v27 = vor.u32 %v228_v19, %v225_v18  ;;  %v239_v28 = vor.u32 %v238_v21, %v234_v20  ;;  %v2046_v30 = vshll.u32 %v6502_v16, 16  ;;  %v2029_v33 = vrot.slane %v2027_v23, 4  ;;  %v204_v44 = vld [vmem:[%s6492_s9 + $0x14] sm:$0x1]  ;;  %v5096_v55 = vld [vmem:[%s6492_s9 + $0x18] sm:$0xf] }
  0x22   : > { %v2032_v34 = vrot.slane %v2030_v24, 5  ;;  %v2038_v35 = vrot.slane %v2036_v25, 5  ;;  %v2042_v40 = vrot.slane %v2040_v29, 4  ;;  %v247_v45 = vshrl.u32 %v172_v31, 16  ;;  %v6537_v60 = vld [vmem:[%s6492_s9 + $0x1c] sm:$0xf] }
  0x23   : > { %v230_v38 = vrot.slane %v229_v27, 4  ;;  %v240_v39 = vrot.slane %v239_v28, 4  ;;  %v2048_v43 = vrot.slane %v2046_v30, 5  ;;  %v250_v46 = vshll.u32 %v172_v31, 16  ;;  %v6545_v1 = vld [vmem:[%s6492_s9 + $0x20] sm:$0x1] }
  0x24   : > { %v2033_v42 = vor.u32 %v2032_v34, %v2029_v33  ;;  %v2043_v49 = vor.u32 %v2042_v40, %v2038_v35  ;;  %v256_v50 = vshll.u32 %v173_v36, 16  ;;  %v249_v53 = vrot.slane %v247_v45, 4  ;;  %v174_v18 = vld [vmem:[%s6492_s9 + $0x18] sm:$0xf]  ;;  %v175_v23 = vld [vmem:[%s6492_s9 + $0x1c] sm:$0xf] }
  0x25   : > { %v235_v47 = vsel %vm6518_vm4, %v230_v38, %v234_v20  ;;  %v245_v48 = vsel %vm6518_vm4, %v240_v39, %v244_v22  ;;  %v252_v54 = vrot.slane %v250_v46, 5  ;;  %v260_v58 = vshrl.u32 %v173_v36, 16  ;;  %v205_v31 = vld [vmem:[%s6492_s9 + $0x20] sm:$0x1]  ;;  %v5099_v40 = vld [vmem:[%s6492_s9 + $0x24] sm:$0xf] }
  0x26   : > { %v4915_v51 = vcombine.low %v235_v47, %v245_v48  ;;  %v2034_v52 = vrot.slane %v2033_v42, 4  ;;  %v2044_v56 = vrot.slane %v2043_v49, 4  ;;  %v258_v57 = vrot.slane %v256_v50, 5  ;;  %v6568_v46 = vld [vmem:[%s6492_s9 + $0x28] sm:$0xf]  ;;  %s8265_s16 = scalar_lea.sflag [#allocation3], %s161_s6 }
  0x27   : > { %v266_v59 = vshll.u32 %v204_v44, 16  ;;  %v2770_v62 = vrot.slane %v6499_v15, 5  ;;  %v2773_v63 = vrot.slane %v6502_v16, 5  ;;  %v253_v0 = vor.u32 %v252_v54, %v249_v53  ;;  %v6577_v54 = vld [vmem:[%s6492_s9 + $0x2c] sm:$0x1]  ;;  %s6335_s27 = sshll.u32 %s6395_s26, 4  ;;  %s6336_s27 = int_to_ptr.vmem [resolvable:$false] %s6335_s27 }
  0x28   : > { %5612 = vmatprep.mubr.msk.bf16.mxu1 %vm656_vm3, %v4915_v51  ;;  %v2039_v61 = vsel %vm6518_vm4, %v2034_v52, %v2038_v35  ;;  %v2049_v2 = vsel %vm6518_vm4, %v2044_v56, %v2048_v43  ;;  %v262_v4 = vrot.slane %v260_v58, 4  ;;  %v2051_v6 = vshrl.u32 %v5096_v55, 16  ;;  %v4995_v51 = vld [vmem:[%s8307_s1 + $0x4] sm:$0x3]  ;;  %v6777_v16 = vld [vmem:[%s6492_s9 + $0x7c] sm:$0xf] }
  0x29   : > { %v268_v5 = vrot.slane %v266_v59, 5  ;;  %v5142_v7 = vcombine.low %v2039_v61, %v2049_v2  ;;  %v254_v8 = vrot.slane %v253_v0, 4  ;;  %v2054_v9 = vshll.u32 %v5096_v55, 16  ;;  %v176_v0 = vld [vmem:[%s6492_s9 + $0x24] sm:$0xf]  ;;  %s6337_s28 = scalar_lea.vmem %s6336_s27, 8192 }
  0x2a   : > { %v2060_v10 = vshll.u32 %v6537_v60, 16  ;;  %v263_v11 = vor.u32 %v262_v4, %v258_v57  ;;  %v2053_v12 = vrot.slane %v2051_v6, 4  ;;  %v2064_v13 = vshrl.u32 %v6537_v60, 16 }
  0x2b   : > { %v2070_v14 = vshll.u32 %v6545_v1, 16  ;;  %5748 = vmatprep.mubr.msk.bf16.mxu0 %vm656_vm3, %v5142_v7  ;;  %v259_v19 = vsel %vm6518_vm4, %v254_v8, %v258_v57  ;;  %v2056_v20 = vrot.slane %v2054_v9, 5  ;;  %v2777_v22 = vrot.slane %v6537_v60, 5  ;;  %v177_v7 = vld [vmem:[%s6492_s9 + $0x28] sm:$0xf] }
  0x2c   : > { %v2062_v21 = vrot.slane %v2060_v10, 5  ;;  %v264_v24 = vrot.slane %v263_v11, 4  ;;  %v2066_v25 = vrot.slane %v2064_v13, 4  ;;  %v2780_v28 = vrot.slane %v6545_v1, 5  ;;  %v206_v13 = vld [vmem:[%s6492_s9 + $0x2c] sm:$0x1] }
  0x2d   : > { %v2072_v27 = vrot.slane %v2070_v14, 5  ;;  %v2057_v29 = vor.u32 %v2056_v20, %v2053_v12  ;;  %v6561_v30 = vrot.slane %v2777_v22, 4  ;;  %v271_v33 = vshrl.u32 %v174_v18, 16 }
  0x2e   : > { %v274_v34 = vshll.u32 %v174_v18, 16  ;;  %v269_v35 = vsel %vm6518_vm4, %v264_v24, %v268_v5  ;;  %v2067_v36 = vor.u32 %v2066_v25, %v2062_v21  ;;  %v280_v38 = vshll.u32 %v175_v23, 16  ;;  %v5102_v24 = vld [vmem:[%s6492_s9 + $0x30] sm:$0xf] }
  0x2f   : > { %v284_v39 = vshrl.u32 %v175_v23, 16  ;;  %v4916_v42 = vcombine.low %v259_v19, %v269_v35  ;;  %v2058_v43 = vrot.slane %v2057_v29, 4  ;;  %v273_v44 = vrot.slane %v271_v33, 4  ;;  %v6597_v33 = vld [vmem:[%s6492_s9 + $0x34] sm:$0xf] }
  0x30   : > { %v276_v45 = vrot.slane %v274_v34, 5  ;;  %v2068_v47 = vrot.slane %v2067_v36, 4  ;;  %v282_v48 = vrot.slane %v280_v38, 5  ;;  %v290_v50 = vshll.u32 %v205_v31, 16 }
  0x31   : > { %v286_v49 = vrot.slane %v284_v39, 4  ;;  %5613 = vmatmul.mubr.msk.bf16.vlgmr.msra.gmra.mrb[0].mxu1 %vm656_vm3, %v4916_v42  ;;  %v2063_v52 = vsel %vm6518_vm4, %v2058_v43, %v2062_v21  ;;  %v2075_v55 = vshrl.u32 %v5099_v40, 16  ;;  %v2078_v56 = vshll.u32 %v5099_v40, 16  ;;  %v6605_v40 = vld [vmem:[%s6492_s9 + $0x38] sm:$0x1] }
  0x32   : > { %v277_v53 = vor.u32 %v276_v45, %v273_v44  ;;  %5645 = vmatpush3.bf16.msra.mxu1 %v6505_v17  ;;  %v2073_v57 = vsel %vm6518_vm4, %v2068_v47, %v2072_v27  ;;  %v292_v59 = vrot.slane %v290_v50, 5  ;;  %v2084_v61 = vshll.u32 %v6568_v46, 16 }
  0x33   : > { %v287_v58 = vor.u32 %v286_v49, %v282_v48  ;;  %v5143_v2 = vcombine.low %v2063_v52, %v2073_v57  ;;  %v2077_v5 = vrot.slane %v2075_v55, 4  ;;  %v2080_v6 = vrot.slane %v2078_v56, 5  ;;  %6176 = vmatprep.subr.msk.bf16.mxu1 %vm705_vm0, %v4995_v51  ;;  %v178_v52 = vld [vmem:[%s6492_s9 + $0x30] sm:$0xf] }
  0x34   : > { %v278_v4 = vrot.slane %v277_v53, 4  ;;  %v2086_v9 = vrot.slane %v2084_v61, 5  ;;  %v2088_v17 = vshrl.u32 %v6568_v46, 16  ;;  %v2094_v10 = vshll.u32 %v6577_v54, 16 }
  0x35   : > { %v288_v8 = vrot.slane %v287_v58, 4  ;;  %5749 = vmatmul.mubr.msk.bf16.vlgmr.msra.gmra.mrb[0].mxu0 %vm656_vm3, %v5143_v2  ;;  %v2081_v12 = vor.u32 %v2080_v6, %v2077_v5  ;;  %v295_v14 = vshrl.u32 %v176_v0, 16  ;;  %v298_v18 = vshll.u32 %v176_v0, 16  ;;  %v179_v58 = vld [vmem:[%s6492_s9 + $0x34] sm:$0xf] }
  0x36   : > { %v283_v11 = vsel %vm6518_vm4, %v278_v4, %v282_v48  ;;  %5781 = vmatpush3.bf16.msra.mxu0 %v6524_v37  ;;  %v2090_v20 = vrot.slane %v2088_v17, 4  ;;  %v2096_v21 = vrot.slane %v2094_v10, 5  ;;  %v304_v23 = vshll.u32 %v177_v7, 16  ;;  %v207_v4 = vld [vmem:[%s6492_s9 + $0x38] sm:$0x1] }
  0x37   : > { %v293_v19 = vsel %vm6518_vm4, %v288_v8, %v292_v59  ;;  %v2082_v27 = vrot.slane %v2081_v12, 4  ;;  %v297_v29 = vrot.slane %v295_v14, 4  ;;  %v300_v31 = vrot.slane %v298_v18, 5  ;;  %6181 = vmatprep.subr.msk.bf16.mxu0 %vm705_vm0, %v6511_v26  ;;  %v5105_v12 = vld [vmem:[%s6492_s9 + $0x3c] sm:$0xf] }
  0x38   : > { %v4917_v25 = vcombine.low %v283_v11, %v293_v19  ;;  %v2091_v34 = vor.u32 %v2090_v20, %v2086_v9  ;;  %v306_v35 = vrot.slane %v304_v23, 5  ;;  %v308_v37 = vshrl.u32 %v177_v7, 16  ;;  %v6622_v20 = vld [vmem:[%s6492_s9 + $0x40] sm:$0xf] }
  0x39   : > { %v314_v36 = vshll.u32 %v206_v13, 16  ;;  %v2087_v38 = vsel %vm6518_vm4, %v2082_v27, %v2086_v9  ;;  %v301_v39 = vor.u32 %v300_v31, %v297_v29  ;;  %v2099_v42 = vshrl.u32 %v5102_v24, 16 }
  0x3a   : > { %5616 = vmatprep.mubr.msk.bf16.mxu1 %vm656_vm3, %v4917_v25  ;;  %v2102_v43 = vshll.u32 %v5102_v24, 16  ;;  %v2092_v44 = vrot.slane %v2091_v34, 4  ;;  %v310_v45 = vrot.slane %v308_v37, 4  ;;  %v2108_v26 = vshll.u32 %v6597_v33, 16  ;;  %v6627_v34 = vld [vmem:[%s6492_s9 + $0x44] sm:$0x1] }
  0x3b   : > { %v316_v47 = vrot.slane %v314_v36, 5  ;;  %v302_v48 = vrot.slane %v301_v39, 4  ;;  %v2101_v49 = vrot.slane %v2099_v42, 4  ;;  %v2112_v51 = vshrl.u32 %v6597_v33, 16  ;;  %v180_v42 = vld [vmem:[%s6492_s9 + $0x3c] sm:$0xf] }
  0x3c   : > { %v2104_v50 = vrot.slane %v2102_v43, 5  ;;  %v2097_v53 = vsel %vm6518_vm4, %v2092_v44, %v2096_v21  ;;  %v311_v55 = vor.u32 %v310_v45, %v306_v35  ;;  %v2110_v56 = vrot.slane %v2108_v26, 5  ;;  %v181_v26 = vld [vmem:[%s6492_s9 + $0x40] sm:$0xf] }
  0x3d   : > { %v2118_v57 = vshll.u32 %v6605_v40, 16  ;;  %v5144_v59 = vcombine.low %v2087_v38, %v2097_v53  ;;  %v307_v61 = vsel %vm6518_vm4, %v302_v48, %v306_v35  ;;  %v2114_v2 = vrot.slane %v2112_v51, 4 }
  0x3e   : > { %v2105_v0 = vor.u32 %v2104_v50, %v2101_v49  ;;  %v312_v5 = vrot.slane %v311_v55, 4  ;;  %v319_v7 = vshrl.u32 %v178_v52, 16  ;;  %v322_v8 = vshll.u32 %v178_v52, 16 }
  0x3f   : > { %v2120_v6 = vrot.slane %v2118_v57, 5  ;;  %5752 = vmatprep.mubr.msk.bf16.mxu0 %vm656_vm3, %v5144_v59  ;;  %v2115_v17 = vor.u32 %v2114_v2, %v2110_v56  ;;  %v328_v10 = vshll.u32 %v179_v58, 16  ;;  %v332_v11 = vshrl.u32 %v179_v58, 16  ;;  %v5108_v2 = vld [vmem:[%s6492_s9 + $0x48] sm:$0xf] }
  0x40   : > { %v2106_v9 = vrot.slane %v2105_v0, 4  ;;  %v317_v13 = vsel %vm6518_vm4, %v312_v5, %v316_v47  ;;  %v321_v14 = vrot.slane %v319_v7, 4  ;;  %v324_v18 = vrot.slane %v322_v8, 5  ;;  %v6645_v8 = vld [vmem:[%s6492_s9 + $0x4c] sm:$0xf] }
  0x41   : > { %v338_v19 = vshll.u32 %v207_v4, 16  ;;  %v4918_v21 = vcombine.low %v307_v61, %v317_v13  ;;  %v2116_v24 = vrot.slane %v2115_v17, 4  ;;  %v330_v25 = vrot.slane %v328_v10, 5  ;;  %v208_v61 = vld [vmem:[%s6492_s9 + $0x44] sm:$0x1] }
  0x42   : > { %v2111_v23 = vsel %vm6518_vm4, %v2106_v9, %v2110_v56  ;;  %v325_v27 = vor.u32 %v324_v18, %v321_v14  ;;  %v334_v29 = vrot.slane %v332_v11, 4  ;;  %v2123_v35 = vshrl.u32 %v5105_v12, 16 }
  0x43   : > { %v340_v31 = vrot.slane %v338_v19, 5  ;;  %5617 = vmatmul.mubr.msk.bf16.gmra.mrb[4].mxu1 %vm656_vm3, %v4918_v21  ;;  %v2121_v37 = vsel %vm6518_vm4, %v2116_v24, %v2120_v6  ;;  %v2126_v36 = vshll.u32 %v5105_v12, 16  ;;  %v2132_v38 = vshll.u32 %v6622_v20, 16 }
  0x44   : > { %v2136_v39 = vshrl.u32 %v6622_v20, 16  ;;  %v5145_v43 = vcombine.low %v2111_v23, %v2121_v37  ;;  %v326_v44 = vrot.slane %v325_v27, 4  ;;  %v335_v45 = vor.u32 %v334_v29, %v330_v25  ;;  %v6653_v23 = vld [vmem:[%s6492_s9 + $0x50] sm:$0x1]  ;;  %v6657_v27 = vld [vmem:[%s6492_s9 + $0x48] sm:$0xf] }
  0x45   : > { %v2125_v47 = vrot.slane %v2123_v35, 4  ;;  %v2128_v48 = vrot.slane %v2126_v36, 5  ;;  %v2134_v49 = vrot.slane %v2132_v38, 5  ;;  %v2142_v51 = vshll.u32 %v6627_v34, 16  ;;  %v6660_v36 = vld [vmem:[%s6492_s9 + $0x4c] sm:$0xf] }
  0x46   : > { %v2138_v50 = vrot.slane %v2136_v39, 4  ;;  %5753 = vmatmul.mubr.msk.bf16.gmra.mrb[4].mxu0 %vm656_vm3, %v5145_v43  ;;  %v331_v52 = vsel %vm6518_vm4, %v326_v44, %v330_v25  ;;  %v336_v53 = vrot.slane %v335_v45, 4  ;;  %v343_v55 = vshrl.u32 %v180_v42, 16 }
  0x47   : > { %v346_v56 = vshll.u32 %v180_v42, 16  ;;  %v2129_v57 = vor.u32 %v2128_v48, %v2125_v47  ;;  %v2144_v59 = vrot.slane %v2142_v51, 5  ;;  %v352_v0 = vshll.u32 %v181_v26, 16 }
  0x48   : > { %v2139_v58 = vor.u32 %v2138_v50, %v2134_v49  ;;  %v341_v4 = vsel %vm6518_vm4, %v336_v53, %v340_v31  ;;  %v345_v5 = vrot.slane %v343_v55, 4  ;;  %v356_v7 = vshrl.u32 %v181_v26, 16  ;;  %v209_v26 = vld [vmem:[%s6492_s9 + $0x50] sm:$0x1]  ;;  %v5111_v53 = vld [vmem:[%s6492_s9 + $0x54] sm:$0xf] }
  0x49   : > { %v348_v6 = vrot.slane %v346_v56, 5  ;;  %v4919_v9 = vcombine.low %v331_v52, %v341_v4  ;;  %v2130_v17 = vrot.slane %v2129_v57, 4  ;;  %v354_v11 = vrot.slane %v352_v0, 5  ;;  %v6676_v4 = vld [vmem:[%s6492_s9 + $0x58] sm:$0xf] }
  0x4a   : > { %v2140_v10 = vrot.slane %v2139_v58, 4  ;;  %v358_v13 = vrot.slane %v356_v7, 4  ;;  %v362_v14 = vshll.u32 %v208_v61, 16  ;;  %v2147_v18 = vshrl.u32 %v5108_v2, 16 }
  0x4b   : > { %v349_v12 = vor.u32 %v348_v6, %v345_v5  ;;  %5620 = vmatprep.mubr.msk.bf16.mxu1 %vm656_vm3, %v4919_v9  ;;  %v2135_v19 = vsel %vm6518_vm4, %v2130_v17, %v2134_v49  ;;  %v2150_v24 = vshll.u32 %v5108_v2, 16  ;;  %v2156_v25 = vshll.u32 %v6645_v8, 16 }
  0x4c   : > { %v2145_v21 = vsel %vm6518_vm4, %v2140_v10, %v2144_v59  ;;  %v359_v35 = vor.u32 %v358_v13, %v354_v11  ;;  %v364_v37 = vrot.slane %v362_v14, 5  ;;  %v2149_v38 = vrot.slane %v2147_v18, 4 }
  0x4d   : > { %v5146_v29 = vcombine.low %v2135_v19, %v2145_v21  ;;  %v350_v31 = vrot.slane %v349_v12, 4  ;;  %v2152_v39 = vrot.slane %v2150_v24, 5  ;;  %v2158_v42 = vrot.slane %v2156_v25, 5  ;;  %v6682_v12 = vld [vmem:[%s6492_s9 + $0x5c] sm:$0x1] }
  0x4e   : > { %v2160_v43 = vshrl.u32 %v6645_v8, 16  ;;  %v360_v45 = vrot.slane %v359_v35, 4  ;;  %v2166_v47 = vshll.u32 %v6653_v23, 16  ;;  %v367_v48 = vshrl.u32 %v6657_v27, 16  ;;  %v6686_v24 = vld [vmem:[%s6492_s9 + $0x54] sm:$0xf] }
  0x4f   : > { %5756 = vmatprep.mubr.msk.bf16.mxu0 %vm656_vm3, %v5146_v29  ;;  %v355_v44 = vsel %vm6518_vm4, %v350_v31, %v354_v11  ;;  %v2153_v49 = vor.u32 %v2152_v39, %v2149_v38  ;;  %v370_v51 = vshll.u32 %v6657_v27, 16  ;;  %v376_v52 = vshll.u32 %v6660_v36, 16 }
  0x50   : > { %v2162_v50 = vrot.slane %v2160_v43, 4  ;;  %v365_v55 = vsel %vm6518_vm4, %v360_v45, %v364_v37  ;;  %v2168_v56 = vrot.slane %v2166_v47, 5  ;;  %v369_v57 = vrot.slane %v367_v48, 4  ;;  %v6692_v37 = vld [vmem:[%s6492_s9 + $0x58] sm:$0xf] }
  0x51   : > { %v380_v58 = vshrl.u32 %v6660_v36, 16  ;;  %v4920_v59 = vcombine.low %v355_v44, %v365_v55  ;;  %v2154_v61 = vrot.slane %v2153_v49, 4  ;;  %v372_v2 = vrot.slane %v370_v51, 5 }
  0x52   : > { %v2163_v0 = vor.u32 %v2162_v50, %v2158_v42  ;;  %v378_v5 = vrot.slane %v376_v52, 5  ;;  %v386_v7 = vshll.u32 %v209_v26, 16  ;;  %v2171_v9 = vshrl.u32 %v5111_v53, 16  ;;  %v210_v26 = vld [vmem:[%s6492_s9 + $0x5c] sm:$0x1] }
  0x53   : > { %v382_v6 = vrot.slane %v380_v58, 4  ;;  %5621 = vmatmul.mubr.msk.bf16.gmra.mrb[8].mxu1 %vm656_vm3, %v4920_v59  ;;  %v2159_v17 = vsel %vm6518_vm4, %v2154_v61, %v2158_v42  ;;  %v373_v11 = vor.u32 %v372_v2, %v369_v57  ;;  %v2174_v13 = vshll.u32 %v5111_v53, 16  ;;  %v5114_v53 = vld [vmem:[%s6492_s9 + $0x60] sm:$0xf]  ;;  %v6706_v59 = vld [vmem:[%s6492_s9 + $0x64] sm:$0xf] }
  0x54   : > { %v2164_v10 = vrot.slane %v2163_v0, 4  ;;  %v388_v18 = vrot.slane %v386_v7, 5  ;;  %v2173_v19 = vrot.slane %v2171_v9, 4  ;;  %v2180_v21 = vshll.u32 %v6676_v4, 16  ;;  %v6713_v9 = vld [vmem:[%s6492_s9 + $0x68] sm:$0x1] }
  0x55   : > { %v383_v14 = vor.u32 %v382_v6, %v378_v5  ;;  %v374_v29 = vrot.slane %v373_v11, 4  ;;  %v2176_v31 = vrot.slane %v2174_v13, 5  ;;  %v2184_v35 = vshrl.u32 %v6676_v4, 16 }
  0x56   : > { %v2169_v25 = vsel %vm6518_vm4, %v2164_v10, %v2168_v56  ;;  %v2182_v42 = vrot.slane %v2180_v21, 5  ;;  %v2190_v43 = vshll.u32 %v6682_v12, 16  ;;  %v391_v48 = vshrl.u32 %v6686_v24, 16 }
  0x57   : > { %v5147_v38 = vcombine.low %v2159_v17, %v2169_v25  ;;  %v384_v39 = vrot.slane %v383_v14, 4  ;;  %v379_v44 = vsel %vm6518_vm4, %v374_v29, %v378_v5  ;;  %v2177_v45 = vor.u32 %v2176_v31, %v2173_v19  ;;  %v6717_v19 = vld [vmem:[%s6492_s9 + $0x60] sm:$0xf] }
  0x58   : > { %v2186_v47 = vrot.slane %v2184_v35, 4  ;;  %v2192_v50 = vrot.slane %v2190_v43, 5  ;;  %v394_v51 = vshll.u32 %v6686_v24, 16  ;;  %v400_v52 = vshll.u32 %v6692_v37, 16  ;;  %v6723_v35 = vld [vmem:[%s6492_s9 + $0x64] sm:$0xf] }
  0x59   : > { %5757 = vmatmul.mubr.msk.bf16.gmra.mrb[8].mxu0 %vm656_vm3, %v5147_v38  ;;  %v389_v49 = vsel %vm6518_vm4, %v384_v39, %v388_v18  ;;  %v2178_v56 = vrot.slane %v2177_v45, 4  ;;  %v393_v58 = vrot.slane %v391_v48, 4  ;;  %v404_v2 = vshrl.u32 %v6692_v37, 16 }
  0x5a   : > { %v4921_v55 = vcombine.low %v379_v44, %v389_v49  ;;  %v2187_v57 = vor.u32 %v2186_v47, %v2182_v42  ;;  %v396_v61 = vrot.slane %v394_v51, 5  ;;  %v402_v0 = vrot.slane %v400_v52, 5 }
  0x5b   : > { %v410_v5 = vshll.u32 %v210_v26, 16  ;;  %v2183_v6 = vsel %vm6518_vm4, %v2178_v56, %v2182_v42  ;;  %v2195_v17 = vshrl.u32 %v5114_v53, 16  ;;  %v2198_v10 = vshll.u32 %v5114_v53, 16 }
  0x5c   : > { %5624 = vmatprep.mubr.msk.bf16.mxu1 %vm656_vm3, %v4921_v55  ;;  %v2188_v7 = vrot.slane %v2187_v57, 4  ;;  %v397_v11 = vor.u32 %v396_v61, %v393_v58  ;;  %v406_v13 = vrot.slane %v404_v2, 4  ;;  %v2204_v18 = vshll.u32 %v6706_v59, 16  ;;  %v5174_v58 = vld [vmem:[%s6492_s9 + $0xc] sm:$0xe] }
  0x5d   : > { %v412_v14 = vrot.slane %v410_v5, 5  ;;  %v2197_v25 = vrot.slane %v2195_v17, 4  ;;  %v2200_v29 = vrot.slane %v2198_v10, 5  ;;  %v2208_v31 = vshrl.u32 %v6706_v59, 16 }
  0x5e   : > { %v2193_v21 = vsel %vm6518_vm4, %v2188_v7, %v2192_v50  ;;  %v398_v39 = vrot.slane %v397_v11, 4  ;;  %v407_v42 = vor.u32 %v406_v13, %v402_v0  ;;  %v2206_v43 = vrot.slane %v2204_v18, 5  ;;  %v211_v50 = vld [vmem:[%s6492_s9 + $0x68] sm:$0x1] }
  0x5f   : > { %v5148_v38 = vcombine.low %v2183_v6, %v2193_v21  ;;  %v2201_v44 = vor.u32 %v2200_v29, %v2197_v25  ;;  %v2210_v45 = vrot.slane %v2208_v31, 4  ;;  %v2214_v47 = vshll.u32 %v6713_v9, 16  ;;  %v6751_v29 = vld [vmem:[%s6492_s9 + $0x70] sm:$0xf] }
  0x60   : > { %v415_v26 = vshrl.u32 %v6717_v19, 16  ;;  %v403_v48 = vsel %vm6518_vm4, %v398_v39, %v402_v0  ;;  %v408_v49 = vrot.slane %v407_v42, 4  ;;  %v418_v51 = vshll.u32 %v6717_v19, 16  ;;  %v6738_v0 = vld [vmem:[%s6492_s9 + $0x6c] sm:$0xf] }
  0x61   : > { %5760 = vmatprep.mubr.msk.bf16.mxu0 %vm656_vm3, %v5148_v38  ;;  %v424_v52 = vshll.u32 %v6723_v35, 16  ;;  %v2202_v53 = vrot.slane %v2201_v44, 4  ;;  %v2211_v55 = vor.u32 %v2210_v45, %v2206_v43  ;;  %v2216_v56 = vrot.slane %v2214_v47, 5 }
  0x62   : > { %v417_v57 = vrot.slane %v415_v26, 4  ;;  %v413_v61 = vsel %vm6518_vm4, %v408_v49, %v412_v14  ;;  %v420_v2 = vrot.slane %v418_v51, 5  ;;  %v428_v6 = vshrl.u32 %v6723_v35, 16  ;;  %v212_v26 = vld [vmem:[%s6492_s9 + $0x74] sm:$0x1] }
  0x63   : > { %v426_v5 = vrot.slane %v424_v52, 5  ;;  %v4922_v7 = vcombine.low %v403_v48, %v413_v61  ;;  %v2207_v17 = vsel %vm6518_vm4, %v2202_v53, %v2206_v43  ;;  %v2212_v10 = vrot.slane %v2211_v55, 4  ;;  %v5175_v48 = vld [vmem:[%s6492_s9 + $0x18] sm:$0xe] }
  0x64   : > { %v434_v11 = vshll.u32 %v211_v50, 16  ;;  %v421_v14 = vor.u32 %v420_v2, %v417_v57  ;;  %v430_v18 = vrot.slane %v428_v6, 4  ;;  %v5190_v21 = vrot.slane %v5174_v58, 9  ;;  %v6770_v53 = vld [vmem:[%s6492_s9 + $0x78] sm:$0xf] }
  0x65   : > { %v2772_v25 = vrot.slane %v2770_v62, 4  ;;  %5625 = vmatmul.mubr.msk.bf16.gmra.mrb[12].mxu1 %vm656_vm3, %v4922_v7  ;;  %v2217_v31 = vsel %vm6518_vm4, %v2212_v10, %v2216_v56  ;;  %v439_v39 = vshrl.u32 %v6738_v0, 16  ;;  %v442_v42 = vshll.u32 %v6738_v0, 16  ;;  %v213_v57 = vld [vmem:[%s6492_s9 + $0x80] sm:$0x1] }
  0x66   : > { %v436_v38 = vrot.slane %v434_v11, 5  ;;  %v5149_v43 = vcombine.low %v2207_v17, %v2217_v31  ;;  %v422_v44 = vrot.slane %v421_v14, 4  ;;  %v431_v45 = vor.u32 %v430_v18, %v426_v5  ;;  %v5176_v10 = vld [vmem:[%s6492_s9 + $0x24] sm:$0xe] }
  0x67   : > { %v2771_v47 = vsel %vm6744_vm7, %v5190_v21, %v2770_v62  ;;  %v2774_v49 = vsel %vm6744_vm7, %v2772_v25, %v2773_v63  ;;  %v441_v50 = vrot.slane %v439_v39, 4  ;;  %v444_v51 = vrot.slane %v442_v42, 5  ;;  %v6796_v39 = vld [vmem:[%s6492_s9 + $0x84] sm:$0xf] }
  0x68   : > { %v448_v52 = vshll.u32 %v6751_v29, 16  ;;  %5761 = vmatmul.mubr.msk.bf16.gmra.mrb[12].mxu0 %vm656_vm3, %v5149_v43  ;;  %v427_v15 = vsel %vm6518_vm4, %v422_v44, %v426_v5  ;;  %v432_v62 = vrot.slane %v431_v45, 4  ;;  %v5207_v55 = vcombine.low %v2771_v47, %v2774_v49  ;;  %v6804_v43 = vld [vmem:[%s6492_s9 + $0x88] sm:$0xf] }
  0x69   : > { %v452_v56 = vshrl.u32 %v6751_v29, 16  ;;  %v445_v63 = vor.u32 %v444_v51, %v441_v50  ;;  %v458_v61 = vshll.u32 %v212_v26, 16  ;;  %v5191_v2 = vrot.slane %v5175_v48, 9 }
  0x6a   : > { %v450_v58 = vrot.slane %v448_v52, 5  ;;  %v437_v6 = vsel %vm6518_vm4, %v432_v62, %v436_v38  ;;  %5782 = vmatprep.mubr.msk.bf16.mxu0 %vm656_vm3, %v5207_v55  ;;  %v2781_v5 = vsel %vm6744_vm7, %v6561_v30, %v2780_v28  ;;  %v463_v17 = vshrl.u32 %v6770_v53, 16  ;;  %v214_v52 = vld [vmem:[%s6492_s9 + $0x8c] sm:$0x1] }
  0x6b   : > { %v454_v7 = vrot.slane %v452_v56, 4  ;;  %v4923_v11 = vcombine.low %v427_v15, %v437_v6  ;;  %v446_v14 = vrot.slane %v445_v63, 4  ;;  %v460_v18 = vrot.slane %v458_v61, 5 }
  0x6c   : > { %v2778_v21 = vsel %vm6744_vm7, %v5191_v2, %v2777_v22  ;;  %v465_v38 = vrot.slane %v463_v17, 4  ;;  %v466_v1 = vshll.u32 %v6770_v53, 16  ;;  %v472_v30 = vshll.u32 %v6777_v16, 16  ;;  %v6809_v22 = vld [vmem:[%s8307_s1 + $0xe] sm:$0x3] }
  0x6d   : > { %v455_v25 = vor.u32 %v454_v7, %v450_v58  ;;  %v5208_v31 = vcombine.low %v2778_v21, %v2781_v5  ;;  %5628 = vmatprep.mubr.msk.bf16.mxu1 %vm656_vm3, %v4923_v11  ;;  %v451_v28 = vsel %vm6518_vm4, %v446_v14, %v450_v58  ;;  %v476_v60 = vshrl.u32 %v6777_v16, 16  ;;  %v6828_v5 = vld [vmem:[%s6492_s9 + $0x90] sm:$0xf] }
  0x6e   : > { %v482_v42 = vshll.u32 %v213_v57, 16  ;;  %v468_v45 = vrot.slane %v466_v1, 5  ;;  %v5192_v47 = vrot.slane %v5176_v10, 9  ;;  %v2784_v26 = vrot.slane %v6568_v46, 5  ;;  %v5177_v57 = vld [vmem:[%s6492_s9 + $0x30] sm:$0xe] }
  0x6f   : > { %v456_v44 = vrot.slane %v455_v25, 4  ;;  %v474_v48 = vrot.slane %v472_v30, 5  ;;  %v478_v49 = vrot.slane %v476_v60, 4  ;;  %v2787_v51 = vrot.slane %v6577_v54, 5  ;;  %v6840_v30 = vld [vmem:[%s6492_s9 + $0x94] sm:$0xf] }
  0x70   : > { %v484_v50 = vrot.slane %v482_v42, 5  ;;  %5783 = vmatmul.mubr.msk.bf16.vlgmr.msra.gmra.mrb[0].mxu0 %vm656_vm3, %v5208_v31  ;;  %v469_v62 = vor.u32 %v468_v45, %v465_v38  ;;  %v2785_v55 = vsel %vm6744_vm7, %v5192_v47, %v2784_v26  ;;  %v2786_v56 = vrot.slane %v2784_v26, 4  ;;  %v215_v60 = vld [vmem:[%s6492_s9 + $0x98] sm:$0x1]  ;;  %v5178_v26 = vld [vmem:[%s6492_s9 + $0x3c] sm:$0xe] }
  0x71   : > { %v461_v15 = vsel %vm6518_vm4, %v456_v44, %v460_v18  ;;  %5815 = vmatpush3.bf16.msra.mxu0 %v6528_v41  ;;  %v479_v46 = vor.u32 %v478_v49, %v474_v48  ;;  %v487_v58 = vshrl.u32 %v6796_v39, 16  ;;  %v490_v54 = vshll.u32 %v6796_v39, 16 }
  0x72   : > { %v4924_v63 = vcombine.low %v451_v28, %v461_v15  ;;  %v470_v61 = vrot.slane %v469_v62, 4  ;;  %v2788_v2 = vsel %vm6744_vm7, %v2786_v56, %v2787_v51  ;;  %v496_v6 = vshll.u32 %v6804_v43, 16  ;;  %6182 = vmatprep.subr.msk.bf16.mxu0 %vm705_vm0, %v6809_v22 }
  0x73   : > { %v500_v7 = vshrl.u32 %v6804_v43, 16  ;;  %v480_v41 = vrot.slane %v479_v46, 4  ;;  %v5209_v17 = vcombine.low %v2785_v55, %v2788_v2  ;;  %v489_v10 = vrot.slane %v487_v58, 4  ;;  %v6860_v46 = vld [vmem:[%s6492_s9 + $0xa0] sm:$0xf] }
  0x74   : > { %5629 = vmatmul.mubr.msk.bf16.gmra.mrb[16].mxu1 %vm656_vm3, %v4924_v63  ;;  %v492_v11 = vrot.slane %v490_v54, 5  ;;  %v475_v14 = vsel %vm6518_vm4, %v470_v61, %v474_v48  ;;  %v498_v18 = vrot.slane %v496_v6, 5  ;;  %v506_v25 = vshll.u32 %v214_v52, 16  ;;  %v6849_v52 = vld [vmem:[%s6492_s9 + $0x9c] sm:$0xf] }
  0x75   : > { %v502_v21 = vrot.slane %v500_v7, 4  ;;  %v485_v31 = vsel %vm6518_vm4, %v480_v41, %v484_v50  ;;  %5786 = vmatprep.mubr.msk.bf16.mxu0 %vm656_vm3, %v5209_v17  ;;  %v5193_v1 = vrot.slane %v5177_v57, 9  ;;  %v2791_v28 = vrot.slane %v6597_v33, 5 }
  0x76   : > { %v493_v38 = vor.u32 %v492_v11, %v489_v10  ;;  %v4925_v42 = vcombine.low %v475_v14, %v485_v31  ;;  %v508_v45 = vrot.slane %v506_v25, 5  ;;  %v2794_v47 = vrot.slane %v6605_v40, 5  ;;  %v216_v10 = vld [vmem:[%s6492_s9 + $0xa4] sm:$0x1]  ;;  %v5179_v11 = vld [vmem:[%s6492_s9 + $0x48] sm:$0xe] }
  0x77   : > { %v503_v44 = vor.u32 %v502_v21, %v498_v18  ;;  %v2792_v49 = vsel %vm6744_vm7, %v5193_v1, %v2791_v28  ;;  %v2793_v50 = vrot.slane %v2791_v28, 4  ;;  %v511_v51 = vshrl.u32 %v6828_v5, 16 }
  0x78   : > { %v494_v48 = vrot.slane %v493_v38, 4  ;;  %5632 = vmatprep.mubr.msk.bf16.mxu1 %vm656_vm3, %v4925_v42  ;;  %v514_v15 = vshll.u32 %v6828_v5, 16  ;;  %v520_v62 = vshll.u32 %v6840_v30, 16  ;;  %v524_v40 = vshrl.u32 %v6840_v30, 16 }
  0x79   : > { %v504_v33 = vrot.slane %v503_v44, 4  ;;  %v2795_v56 = vsel %vm6744_vm7, %v2793_v50, %v2794_v47  ;;  %v513_v57 = vrot.slane %v511_v51, 4  ;;  %v530_v63 = vshll.u32 %v215_v60, 16 }
  0x7a   : > { %v499_v55 = vsel %vm6518_vm4, %v494_v48, %v498_v18  ;;  %v5210_v54 = vcombine.low %v2792_v49, %v2795_v56  ;;  %v516_v61 = vrot.slane %v514_v15, 5  ;;  %v522_v2 = vrot.slane %v520_v62, 5  ;;  %v6886_v56 = vld [vmem:[%s6492_s9 + $0xac] sm:$0xf] }
  0x7b   : > { %v509_v58 = vsel %vm6518_vm4, %v504_v33, %v508_v45  ;;  %v526_v7 = vrot.slane %v524_v40, 4  ;;  %v532_v41 = vrot.slane %v530_v63, 5  ;;  %v5194_v17 = vrot.slane %v5178_v26, 9  ;;  %v6881_v33 = vld [vmem:[%s6492_s9 + $0xa8] sm:$0xf] }
  0x7c   : > { %v4926_v6 = vcombine.low %v499_v55, %v509_v58  ;;  %5787 = vmatmul.mubr.msk.bf16.gmra.mrb[4].mxu0 %vm656_vm3, %v5210_v54  ;;  %v517_v14 = vor.u32 %v516_v61, %v513_v57  ;;  %v2798_v18 = vrot.slane %v6622_v20, 5  ;;  %v2801_v21 = vrot.slane %v6627_v34, 5  ;;  %v217_v61 = vld [vmem:[%s6492_s9 + $0xb0] sm:$0x1] }
  0x7d   : > { %v535_v25 = vshrl.u32 %v6849_v52, 16  ;;  %v527_v31 = vor.u32 %v526_v7, %v522_v2  ;;  %v538_v38 = vshll.u32 %v6849_v52, 16  ;;  %v544_v1 = vshll.u32 %v6860_v46, 16 }
  0x7e   : > { %5633 = vmatmul.mubr.msk.bf16.gmra.mrb[20].mxu1 %vm656_vm3, %v4926_v6  ;;  %v548_v28 = vshrl.u32 %v6860_v46, 16  ;;  %v518_v60 = vrot.slane %v517_v14, 4  ;;  %v2799_v42 = vsel %vm6744_vm7, %v5194_v17, %v2798_v18  ;;  %v2800_v20 = vrot.slane %v2798_v18, 4  ;;  %v6901_v14 = vld [vmem:[%s6492_s9 + $0xb4] sm:$0xf] }
  0x7f   : > { %v537_v44 = vrot.slane %v535_v25, 4  ;;  %v528_v34 = vrot.slane %v527_v31, 4  ;;  %v540_v45 = vrot.slane %v538_v38, 5  ;;  %v546_v47 = vrot.slane %v544_v1, 5 }
  0x80   : > { %v550_v26 = vrot.slane %v548_v28, 4  ;;  %v523_v48 = vsel %vm6518_vm4, %v518_v60, %v522_v2  ;;  %v2802_v49 = vsel %vm6744_vm7, %v2800_v20, %v2801_v21  ;;  %v554_v50 = vshll.u32 %v216_v10, 16  ;;  %v5180_v2 = vld [vmem:[%s6492_s9 + $0x54] sm:$0xe] }
  0x81   : > { %v5195_v51 = vrot.slane %v5179_v11, 9  ;;  %v533_v15 = vsel %vm6518_vm4, %v528_v34, %v532_v41  ;;  %v5211_v62 = vcombine.low %v2799_v42, %v2802_v49  ;;  %v541_v40 = vor.u32 %v540_v45, %v537_v44  ;;  %v6910_v42 = vld [vmem:[%s6492_s9 + $0xb8] sm:$0xf]  ;;  %v218_v49 = vld [vmem:[%s6492_s9 + $0xbc] sm:$0x1] }
  0x82   : > { %v551_v55 = vor.u32 %v550_v26, %v546_v47  ;;  %v4927_v57 = vcombine.low %v523_v48, %v533_v15  ;;  %v556_v63 = vrot.slane %v554_v50, 5  ;;  %v2805_v58 = vrot.slane %v6645_v8, 5 }
  0x83   : > { %v2808_v54 = vrot.slane %v6653_v23, 5  ;;  %5790 = vmatprep.mubr.msk.bf16.mxu0 %vm656_vm3, %v5211_v62  ;;  %v542_v6 = vrot.slane %v541_v40, 4  ;;  %v559_v41 = vshrl.u32 %v6881_v33, 16  ;;  %v562_v17 = vshll.u32 %v6881_v33, 16 }
  0x84   : > { %v552_v7 = vrot.slane %v551_v55, 4  ;;  %5636 = vmatprep.mubr.msk.bf16.mxu1 %vm656_vm3, %v4927_v57  ;;  %v2806_v10 = vsel %vm6744_vm7, %v5195_v51, %v2805_v58  ;;  %v2807_v11 = vrot.slane %v2805_v58, 4  ;;  %v568_v8 = vshll.u32 %v6886_v56, 16  ;;  %v5181_v55 = vld [vmem:[%s6492_s9 + $0x60] sm:$0xe] }
  0x85   : > { %v572_v23 = vshrl.u32 %v6886_v56, 16  ;;  %v547_v18 = vsel %vm6518_vm4, %v542_v6, %v546_v47  ;;  %v561_v25 = vrot.slane %v559_v41, 4  ;;  %v564_v31 = vrot.slane %v562_v17, 5  ;;  %v5182_v6 = vld [vmem:[%s6492_s9 + $0x6c] sm:$0xe] }
  0x86   : > { %v557_v21 = vsel %vm6518_vm4, %v552_v7, %v556_v63  ;;  %v2809_v1 = vsel %vm6744_vm7, %v2807_v11, %v2808_v54  ;;  %v570_v28 = vrot.slane %v568_v8, 5  ;;  %v578_v34 = vshll.u32 %v217_v61, 16  ;;  %v5118_v11 = vld [vmem:[%s6492_s9 + $0x70] sm:$0xf]  ;;  %v5119_v8 = vld [vmem:[%s6492_s9 + $0x74] sm:$0x1] }
  0x87   : > { %v4928_v38 = vcombine.low %v547_v18, %v557_v21  ;;  %v574_v60 = vrot.slane %v572_v23, 4  ;;  %v5212_v20 = vcombine.low %v2806_v10, %v2809_v1  ;;  %v565_v44 = vor.u32 %v564_v31, %v561_v25 }
  0x88   : > { %v5196_v45 = vrot.slane %v5180_v2, 9  ;;  %v2812_v26 = vrot.slane %v6676_v4, 5  ;;  %v2815_v48 = vrot.slane %v6682_v12, 5  ;;  %v583_v50 = vshrl.u32 %v6901_v14, 16 }
  0x89   : > { %5637 = vmatmul.mubr.msk.bf16.gmra.mrb[24].mxu1 %vm656_vm3, %v4928_v38  ;;  %v575_v47 = vor.u32 %v574_v60, %v570_v28  ;;  %5791 = vmatmul.mubr.msk.bf16.gmra.mrb[8].mxu0 %vm656_vm3, %v5212_v20  ;;  %v566_v51 = vrot.slane %v565_v44, 4  ;;  %v580_v15 = vrot.slane %v578_v34, 5  ;;  %v586_v62 = vshll.u32 %v6901_v14, 16 }
  0x8a   : > { %v592_v40 = vshll.u32 %v6910_v42, 16  ;;  %v2813_v4 = vsel %vm6744_vm7, %v5196_v45, %v2812_v26  ;;  %v2814_v12 = vrot.slane %v2812_v26, 4  ;;  %v585_v63 = vrot.slane %v583_v50, 4 }
  0x8b   : > { %v576_v57 = vrot.slane %v575_v47, 4  ;;  %v571_v58 = vsel %vm6518_vm4, %v566_v51, %v570_v28  ;;  %v588_v54 = vrot.slane %v586_v62, 5  ;;  %v596_v2 = vshrl.u32 %v6910_v42, 16  ;;  %v5183_v47 = vld [vmem:[%s6492_s9 + $0x78] sm:$0xe] }
  0x8c   : > { %v594_v61 = vrot.slane %v592_v40, 5  ;;  %v2816_v41 = vsel %vm6744_vm7, %v2814_v12, %v2815_v48  ;;  %v602_v17 = vshll.u32 %v218_v49, 16  ;;  %v5197_v10 = vrot.slane %v5181_v55, 9  ;;  %v6274_v51 = vld [vmem:[%s6492_s9] sm:$0xf] }
  0x8d   : > { %v581_v7 = vsel %vm6518_vm4, %v576_v57, %v580_v15  ;;  %v5213_v18 = vcombine.low %v2813_v4, %v2816_v41  ;;  %v589_v21 = vor.u32 %v588_v54, %v585_v63  ;;  %v598_v25 = vrot.slane %v596_v2, 4  ;;  %v6948_v15 = vld [vmem:[%s6492_s9 + $0x4] sm:$0xf]  ;;  %v6952_v40 = vld [vmem:[%s6492_s9 + $0x7c] sm:$0xf] }
  0x8e   : > { %v4929_v23 = vcombine.low %v571_v58, %v581_v7  ;;  %v604_v31 = vrot.slane %v602_v17, 5  ;;  %v2819_v38 = vrot.slane %v6706_v59, 5  ;;  %v2822_v1 = vrot.slane %v6713_v9, 5  ;;  %v6955_v55 = vld [vmem:[%s6492_s9 + $0x80] sm:$0x1] }
  0x8f   : > { %v5198_v28 = vrot.slane %v5182_v6, 9  ;;  %5794 = vmatprep.mubr.msk.bf16.mxu0 %vm656_vm3, %v5213_v18  ;;  %v590_v60 = vrot.slane %v589_v21, 4  ;;  %v599_v20 = vor.u32 %v598_v25, %v594_v61  ;;  %v2826_v44 = vrot.slane %v5118_v11, 5  ;;  %v5124_v57 = vld [vmem:[%s6492_s9 + $0x88] sm:$0xf] }
  0x90   : > { %5640 = vmatprep.mubr.msk.bf16.mxu1 %vm656_vm3, %v4929_v23  ;;  %v2829_v34 = vrot.slane %v5119_v8, 5  ;;  %v2820_v45 = vsel %vm6744_vm7, %v5197_v10, %v2819_v38  ;;  %v2821_v59 = vrot.slane %v2819_v38, 4  ;;  %v4947_v62 = vcombine.low %v6274_v51, %v6948_v15  ;;  %v5125_v54 = vld [vmem:[%s6492_s9 + $0x8c] sm:$0x1]  ;;  %v5127_v17 = vld [vmem:[%s6492_s9 + $0x94] sm:$0xf] }
  0x91   : > { %v595_v9 = vsel %vm6518_vm4, %v590_v60, %v594_v61  ;;  %v600_v26 = vrot.slane %v599_v20, 4  ;;  %v2827_v48 = vsel %vm6744_vm7, %v5198_v28, %v2826_v44  ;;  %v2828_v49 = vrot.slane %v2826_v44, 4  ;;  %v5184_v61 = vld [vmem:[%s6492_s9 + $0x84] sm:$0xe]  ;;  %v5185_v23 = vld [vmem:[%s6492_s9 + $0x90] sm:$0xe] }
  0x92   : > { %v2823_v50 = vsel %vm6744_vm7, %v2821_v59, %v2822_v1  ;;  %v5199_v58 = vrot.slane %v5183_v47, 9  ;;  %v2833_v7 = vrot.slane %v6952_v40, 5  ;;  %v2836_v41 = vrot.slane %v6955_v55, 5  ;;  %v5128_v25 = vld [vmem:[%s6492_s9 + $0x98] sm:$0x1] }
  0x93   : > { %v605_v4 = vsel %vm6518_vm4, %v600_v26, %v604_v31  ;;  %v5214_v12 = vcombine.low %v2820_v45, %v2823_v50  ;;  %v2830_v63 = vsel %vm6744_vm7, %v2828_v49, %v2829_v34  ;;  %v5200_v10 = vrot.slane %v5184_v61, 9  ;;  %v5130_v31 = vld [vmem:[%s6492_s9 + $0xa0] sm:$0xf]  ;;  %v5131_v60 = vld [vmem:[%s6492_s9 + $0xa4] sm:$0x1] }
  0x94   : > { %v4930_v2 = vcombine.low %v595_v9, %v605_v4  ;;  %v5215_v6 = vcombine.low %v2827_v48, %v2830_v63  ;;  %v2840_v11 = vrot.slane %v5124_v57, 5  ;;  %v2843_v8 = vrot.slane %v5125_v54, 5  ;;  %v5186_v20 = vld [vmem:[%s6492_s9 + $0x9c] sm:$0xe]  ;;  %v6276_v44 = vld [vmem:[%s6492_s9 + $0xc] sm:$0xf] }
  0x95   : > { %5795 = vmatmul.mubr.msk.bf16.gmra.mrb[12].mxu0 %vm656_vm3, %v5214_v12  ;;  %v2834_v18 = vsel %vm6744_vm7, %v5199_v58, %v2833_v7  ;;  %v2835_v21 = vrot.slane %v2833_v7, 4  ;;  %v2847_v28 = vrot.slane %v5127_v17, 5  ;;  %v6982_v34 = vld [vmem:[%s6492_s9 + $0x10] sm:$0xf]  ;;  %v6278_v47 = vld [vmem:[%s6492_s9 + $0x18] sm:$0xf] }
  0x96   : > { %5641 = vmatmul.mubr.msk.bf16.gmra.mrb[28].mxu1 %vm656_vm3, %v4930_v2  ;;  %5798 = vmatprep.mubr.msk.bf16.mxu0 %vm656_vm3, %v5215_v6  ;;  %v2841_v38 = vsel %vm6744_vm7, %v5200_v10, %v2840_v11  ;;  %v2842_v1 = vrot.slane %v2840_v11, 4  ;;  %v4948_v45 = vcombine.low %v6276_v44, %v6982_v34  ;;  %v6989_v9 = vld [vmem:[%s6492_s9 + $0x1c] sm:$0xf]  ;;  %v5201_v48 = vrot.slane %v5185_v23, 9  ;;  %v5133_v57 = vld [vmem:[%s6492_s9 + $0xac] sm:$0xf] }
  0x97   : > { %5646 = vmatprep.mubr.msk.bf16.mxu1 %vm656_vm3, %v4947_v62  ;;  %v2837_v59 = vsel %vm6744_vm7, %v2835_v21, %v2836_v41  ;;  %v4949_v26 = vcombine.low %v6278_v47, %v6989_v9  ;;  %v2849_v51 = vrot.slane %v2847_v28, 4  ;;  %v2850_v62 = vrot.slane %v5128_v25, 5  ;;  %v6280_v54 = vld [vmem:[%s8307_s1 + $0x4] sm:$0x3]  ;;  %v5136_v2 = vld [vmem:[%s6492_s9 + $0xb8] sm:$0xf] }
  0x98   : > { %v5216_v49 = vcombine.low %v2834_v18, %v2837_v59  ;;  %v2844_v50 = vsel %vm6744_vm7, %v2842_v1, %v2843_v8  ;;  %v5202_v12 = vrot.slane %v5186_v20, 9  ;;  %v2854_v63 = vrot.slane %v5130_v31, 5  ;;  %v7004_v7 = vld [vmem:[%s8307_s1 + $0x6] sm:$0x3]  ;;  %v5134_v10 = vld [vmem:[%s6492_s9 + $0xb0] sm:$0x1] }
  0x99   : > { %v5217_v4 = vcombine.low %v2841_v38, %v2844_v50  ;;  %v2857_v58 = vrot.slane %v5131_v60, 5  ;;  %v1424_v61 = vsel %vm705_vm0, %v6280_v54, 0  ;;  %v2848_v41 = vsel %vm6744_vm7, %v5201_v48, %v2847_v28  ;;  %v5187_v11 = vld [vmem:[%s6492_s9 + $0xa8] sm:$0xe]  ;;  %v5137_v25 = vld [vmem:[%s6492_s9 + $0xbc] sm:$0x1] }
  0x9a   : > { %v2856_v6 = vrot.slane %v2854_v63, 4  ;;  %v2851_v17 = vsel %vm6744_vm7, %v2849_v51, %v2850_v62  ;;  %v2861_v8 = vrot.slane %v5133_v57, 5  ;;  %v2855_v23 = vsel %vm6744_vm7, %v5202_v12, %v2854_v63  ;;  %v5188_v31 = vld [vmem:[%s6492_s9 + $0xb4] sm:$0xe]  ;;  %v6281_v38 = vld [vmem:[%s6492_s9 + $0x24] sm:$0xf] }
  0x9b   : > { %v2868_v21 = vrot.slane %v5136_v2, 5  ;;  %v7025_v1 = vld [vmem:[%s6492_s9 + $0x28] sm:$0xf]  ;;  %v5218_v60 = vcombine.low %v2848_v41, %v2851_v17  ;;  %v5203_v44 = vrot.slane %v5187_v11, 9  ;;  %v2864_v59 = vrot.slane %v5134_v10, 5 }
  0x9c   : > { %v2858_v18 = vsel %vm6744_vm7, %v2856_v6, %v2857_v58  ;;  %v4950_v28 = vcombine.low %v6281_v38, %v7025_v1  ;;  %v6283_v47 = vld [vmem:[%s6492_s9 + $0x30] sm:$0xf]  ;;  %v2871_v51 = vrot.slane %v5137_v25, 5  ;;  %v5139_v62 = vld [vmem:[%s6492_s9 + $0xc4] sm:$0xf]  ;;  %v2256_v25 = vshrl.u32 %v6952_v40, 16 }
  0x9d   : > { %5799 = vmatmul.mubr.msk.bf16.gmra.mrb[16].mxu0 %vm656_vm3, %v5216_v49  ;;  %v5219_v20 = vcombine.low %v2855_v23, %v2858_v18  ;;  %v5204_v49 = vrot.slane %v5188_v31, 9  ;;  %v2870_v50 = vrot.slane %v2868_v21, 4  ;;  %v2862_v57 = vsel %vm6744_vm7, %v5203_v44, %v2861_v8  ;;  %v5189_v12 = vld [vmem:[%s6492_s9 + $0xc0] sm:$0xe]  ;;  %v6285_v41 = vld [vmem:[%s6492_s9 + $0x3c] sm:$0xf] }
  0x9e   : > { %5647 = vmatmul.mubr.msk.bf16.vlgmr.msra.gmra.mrb[0].mxu1 %vm656_vm3, %v4948_v45  ;;  %5802 = vmatprep.mubr.msk.bf16.mxu0 %vm656_vm3, %v5217_v4  ;;  %v2863_v45 = vrot.slane %v2861_v8, 4  ;;  %v2875_v63 = vrot.slane %v5139_v62, 5  ;;  %v5205_v6 = vrot.slane %v5189_v12, 9  ;;  %v7050_v17 = vld [vmem:[%s6492_s9 + $0x40] sm:$0xf]  ;;  %v4953_v18 = vcombine.low %v6657_v27, %v6660_v36  ;;  %v6237_v62 = vld [vmem:[%s6492_s9 + $0x24] sm:$0xff]  }
  0x9f   : > { %5679 = vmatpush3.bf16.msra.mxu1 %v1424_v61  ;;  %5650 = vmatprep.mubr.msk.bf16.mxu1 %vm656_vm3, %v4949_v26  ;;  %v7030_v26 = vld [vmem:[%s6492_s9 + $0x34] sm:$0xf]  ;;  %v2869_v58 = vsel %vm6744_vm7, %v5204_v49, %v2868_v21  ;;  %v2872_v54 = vsel %vm6744_vm7, %v2870_v50, %v2871_v51  ;;  %v5140_v61 = vld [vmem:[%s6492_s9 + $0xc8] sm:$0x1]  ;;  %v4952_v10 = vcombine.low %v6285_v41, %v7050_v17  ;;  %v2252_v21 = vshll.u32 %v6952_v40, 16 }
  0xa0   : > { %6177 = vmatprep.subr.msk.bf16.mxu1 %vm705_vm0, %v7004_v7  ;;  %v4951_v48 = vcombine.low %v6283_v47, %v7030_v26  ;;  %v2865_v4 = vsel %vm6744_vm7, %v2863_v45, %v2864_v59  ;;  %v5221_v11 = vcombine.low %v2869_v58, %v2872_v54  ;;  %v2877_v8 = vrot.slane %v2875_v63, 4  ;;  %v1162_v45 = vld [vmem:[%s6492_s9] sm:$0xe]  ;;  %v1163_v59 = vld [vmem:[%s6492_s9 + $0xc] sm:$0xe] }
  0xa1   : > { %v5220_v2 = vcombine.low %v2862_v57, %v2865_v4  ;;  %v2878_v23 = vrot.slane %v5140_v61, 5  ;;  %v2876_v31 = vsel %vm6744_vm7, %v5205_v6, %v2875_v63  ;;  %v7065_v27 = vrot.slane %v2252_v21, 5  ;;  %v1166_v41 = vld [vmem:[%s6492_s9 + $0x30] sm:$0xe] }
  0xa2   : > { %v2258_v36 = vrot.slane %v2256_v25, 4  ;;  %v4955_v44 = vcombine.low %v6717_v19, %v6723_v35  ;;  %v2262_v47 = vshll.u32 %v6955_v55, 16  ;;  %v4979_v19 = vrot.slane %v1162_v45, 9 }
  0xa3   : > { %v2879_v38 = vsel %vm6744_vm7, %v2877_v8, %v2878_v23  ;;  %8330 = vst [vmem:[#allocation6_spill] sm:$0xff] %v7065_v27  ;;  %v4980_v35 = vrot.slane %v1163_v59, 9  ;;  %v1229_v4 = vrot.slane %v6989_v9, 5  ;;  %v1236_v12 = vrot.slane %v7025_v1, 5  ;;  %v1167_v8 = vld [vmem:[%s6492_s9 + $0x3c] sm:$0xe] }
  0xa4   : > { %v5222_v40 = vcombine.low %v2876_v31, %v2879_v38  ;;  %v2259_v49 = vor.u32 %v2258_v36, %v7065_v27  ;;  %v7085_v51 = vrot.slane %v2262_v47, 5  ;;  %v4956_v58 = vcombine.low %v6738_v0, %v6751_v29  ;;  %v1168_v31 = vld [vmem:[%s6492_s9 + $0x48] sm:$0xe]  ;;  %v6291_v59 = vld [vmem:[%s6492_s9 + $0x38] sm:$0x1] }
  0xa5   : > { %5803 = vmatmul.mubr.msk.bf16.gmra.mrb[20].mxu0 %vm656_vm3, %v5218_v60  ;;  %v4954_v60 = vcombine.low %v6686_v24, %v6692_v37  ;;  %v6288_v24 = vld [vmem:[%s6492_s9 + $0x14] sm:$0x1]  ;;  %v4064_v54 = vsel %vm705_vm0, %v6809_v22, 0  ;;  %v4957_v61 = vcombine.low %v6770_v53, %v6777_v16  ;;  %v4958_v6 = vcombine.low %v6796_v39, %v6804_v43  ;;  %v6289_v16 = vld [vmem:[%s6492_s9 + $0x20] sm:$0x1] }
  0xa6   : > { %5651 = vmatmul.mubr.msk.bf16.gmra.mrb[4].mxu1 %vm656_vm3, %v4950_v28  ;;  %5806 = vmatprep.mubr.msk.bf16.mxu0 %vm656_vm3, %v5219_v20  ;;  %v1222_v28 = vrot.slane %v6982_v34, 5  ;;  %v6235_v20 = vld [vmem:[%s6492_s9 + $0x18] sm:$0xff]   ;;  %v6287_v34 = vld [vmem:[%s6492_s9 + $0x8] sm:$0x1]  ;;  %v1225_v37 = vrot.slane %v6288_v24, 5  ;;  %8331 = vst [vmem:[#allocation7_spill] sm:$0xff] %v7085_v51  ;;  %v4959_v9 = vcombine.low %v6828_v5, %v6840_v30 }
  0xa7   : > { %5654 = vmatprep.mubr.msk.bf16.mxu1 %vm656_vm3, %v4951_v48  ;;  %v1215_v48 = vrot.slane %v6948_v15, 5  ;;  %v1218_v50 = vrot.slane %v6287_v34, 5  ;;  %v1164_v15 = vld [vmem:[%s6492_s9 + $0x18] sm:$0xe]  ;;  %v7090_v63 = vrot.slane %v2259_v49, 4  ;;  %v1232_v22 = vrot.slane %v6289_v16, 5 }
  0xa8   : > { %v1224_v55 = vrot.slane %v1222_v28, 4  ;;  %v4981_v1 = vrot.slane %v1164_v15, 9  ;;  %v7112_v29 = vsel %vm6744_vm7, %v4980_v35, %v1222_v28  ;;  %v1238_v25 = vrot.slane %v1236_v12, 4  ;;  %v5304_v24 = vld [vmem:[%s6492_s9 + $0x18] sm:$0xf] }
  0xa9   : > { %v1217_v57 = vrot.slane %v1215_v48, 4  ;;  %8332 = vst [vmem:[#allocation8_spill] sm:$0xff] %v7090_v63  ;;  %v7108_v0 = vsel %vm6744_vm7, %v4979_v19, %v1215_v48  ;;  %v1246_v47 = vrot.slane %v6291_v59, 5  ;;  %v7149_v49 = vsel %vm705_vm0, %v7004_v7, 0  ;;  %v5305_v7 = vld [vmem:[%s6492_s9 + $0x1c] sm:$0xf] }
  0xaa   : > { %v7116_v53 = vsel %vm6744_vm7, %v1224_v55, %v1225_v37  ;;  %v7153_v34 = vsel %vm6744_vm7, %v4981_v1, %v1229_v4  ;;  %v6241_v37 = vld [vmem:[%s6492_s9 + $0x3c] sm:$0xff]   ;;  %v4984_v35 = vrot.slane %v1167_v8, 9  ;;  %v6292_v55 = vld [vmem:[%s6492_s9 + $0x44] sm:$0x1]  ;;  %v3585_v8 = vshll.u32 %v5304_v24, 16 }
  0xab   : > { %v7127_v23 = vsel %vm6744_vm7, %v1217_v57, %v1218_v50  ;;  %v1169_v50 = vld [vmem:[%s6492_s9 + $0x54] sm:$0xe]  ;;  %v1253_v15 = vrot.slane %v6292_v55, 5  ;;  %v5308_v39 = vld [vmem:[%s6492_s9 + $0x28] sm:$0xf] }
  0xac   : > { %v6299_v5 = vld [vmem:[%s6492_s9 + $0x70] sm:$0xf] }
  0xad   : > { %5807 = vmatmul.mubr.msk.bf16.gmra.mrb[24].mxu0 %vm656_vm3, %v5220_v2  ;;  %v1165_v2 = vld [vmem:[%s6492_s9 + $0x24] sm:$0xe]  ;;  %v1278_v30 = vrot.slane %v6299_v5, 5 }
  0xae   : > { %5655 = vmatmul.mubr.msk.bf16.gmra.mrb[8].mxu1 %vm656_vm3, %v4952_v10  ;;  %5810 = vmatprep.mubr.msk.bf16.mxu0 %vm656_vm3, %v5221_v11  ;;  %v1243_v10 = vrot.slane %v7030_v26, 5  ;;  %v6239_v11 = vld [vmem:[%s6492_s9 + $0x30] sm:$0xff]   ;;  %v4982_v21 = vrot.slane %v1165_v2, 9 }
  0xaf   : > { %5658 = vmatprep.mubr.msk.bf16.mxu1 %vm656_vm3, %v4953_v18  ;;  %v7123_v26 = vld [vmem:[%s8307_s1 + $0x10] sm:$0x3]  ;;  %v1231_v18 = vrot.slane %v1229_v4, 4  ;;  %v1280_v48 = vrot.slane %v1278_v30, 4 }
  0xb0   : > { %v1245_v45 = vrot.slane %v1243_v10, 4  ;;  %v7160_v19 = vsel %vm6744_vm7, %v4982_v21, %v1236_v12  ;;  %v3595_v21 = vshrl.u32 %v5305_v7, 16 }
  0xb1   : > { %v7169_v4 = vsel %vm6744_vm7, %v1231_v18, %v1232_v22  ;;  %v3582_v22 = vshrl.u32 %v5304_v24, 16  ;;  %v3591_v18 = vshll.u32 %v5305_v7, 16  ;;  %v5307_v24 = vld [vmem:[%s6492_s9 + $0x24] sm:$0xf] }
  0xb2   : > { %v7182_v1 = vsel %vm6744_vm7, %v1245_v45, %v1246_v47 }
  0xb3   : > { %v3584_v43 = vrot.slane %v3582_v22, 4  ;;  %v7224_v7 = vrot.slane %v3591_v18, 5  ;;  %v3609_v22 = vshll.u32 %v5307_v24, 16  ;;  %v3619_v18 = vshrl.u32 %v5308_v39, 16 }
  0xb5   : > { %5811 = vmatmul.mubr.msk.bf16.gmra.mrb[28].mxu0 %vm656_vm3, %v5222_v40  ;;  %v6290_v40 = vld [vmem:[%s6492_s9 + $0x2c] sm:$0x1]  ;;  %v3611_v27 = vrot.slane %v3609_v22, 5 }
  0xb6   : > { %5659 = vmatmul.mubr.msk.bf16.gmra.mrb[12].mxu1 %vm656_vm3, %v4954_v60  ;;  %5816 = vmatprep.mubr.msk.bf16.mxu0 %vm656_vm3, %v6235_v20  ;;  %v1239_v28 = vrot.slane %v6290_v40, 5  ;;  %v1250_v60 = vrot.slane %v7050_v17, 5  ;;  %v6295_v40 = vld [vmem:[%s6492_s9 + $0x50] sm:$0x1]  ;;  %v6300_v17 = vld [vmem:[%s6492_s9 + $0x74] sm:$0x1] }
  0xb7   : > { %5662 = vmatprep.mubr.msk.bf16.mxu1 %vm656_vm3, %v4955_v44  ;;  %v4983_v44 = vrot.slane %v1166_v41, 9  ;;  %v4986_v41 = vrot.slane %v1169_v50, 9  ;;  %v1170_v50 = vld [vmem:[%s6492_s9 + $0x60] sm:$0xe]  ;;  %v5309_v20 = vld [vmem:[%s6492_s9 + $0x2c] sm:$0x1] }
  0xb8   : > { %v1252_v12 = vrot.slane %v1250_v60, 4  ;;  %v7195_v45 = vsel %vm6744_vm7, %v4984_v35, %v1250_v60  ;;  %v6296_v35 = vld [vmem:[%s6492_s9 + $0x5c] sm:$0x1] }
  0xb9   : > { %v7178_v2 = vsel %vm6744_vm7, %v4983_v44, %v1243_v10  ;;  %v1267_v55 = vrot.slane %v6296_v35, 5  ;;  %v1171_v35 = vld [vmem:[%s6492_s9 + $0x6c] sm:$0xe] }
  0xba   : > { %v7199_v59 = vsel %vm6744_vm7, %v1252_v12, %v1253_v15  ;;  %v6297_v15 = vld [vmem:[%s6492_s9 + $0x64] sm:$0xf]  ;;  %v3597_v12 = vrot.slane %v3595_v21, 4  ;;  %v4988_v5 = vrot.slane %v1171_v35, 9 }
  0xbb   : > { %v6247_v21 = vld [vmem:[%s6492_s9 + $0x60] sm:$0xff]  }
  0xbd   : > { %5817 = vmatmul.mubr.msk.bf16.vlgmr.msra.gmra.mrb[0].mxu0 %vm656_vm3, %v6237_v62  ;;  %v6293_v62 = vld [vmem:[%s6492_s9 + $0x4c] sm:$0xf] }
  0xbe   : > { %5663 = vmatmul.mubr.msk.bf16.gmra.mrb[16].mxu1 %vm656_vm3, %v4956_v58  ;;  %5849 = vmatpush3.bf16.msra.mxu0 %v4064_v54  ;;  %v1257_v57 = vrot.slane %v6293_v62, 5  ;;  %v7173_v58 = vsel %vm6744_vm7, %v1238_v25, %v1239_v28  ;;  %v4985_v54 = vrot.slane %v1168_v31, 9  ;;  %v1260_v28 = vrot.slane %v6295_v40, 5 }
  0xbf   : > { %5666 = vmatprep.mubr.msk.bf16.mxu1 %vm656_vm3, %v4957_v61  ;;  %5820 = vmatprep.mubr.msk.bf16.mxu0 %vm656_vm3, %v6239_v11  ;;  %v6243_v61 = vld [vmem:[%s6492_s9 + $0x48] sm:$0xff]   ;;  %v6294_v11 = vld [vmem:[%s6492_s9 + $0x58] sm:$0xf]  ;;  %v1271_v62 = vrot.slane %v6297_v15, 5  ;;  %v5311_v15 = vld [vmem:[%s6492_s9 + $0x34] sm:$0xf] }
  0xc0   : > { %6183 = vmatprep.subr.msk.bf16.mxu0 %vm705_vm0, %v7123_v26  ;;  %v1264_v16 = vrot.slane %v6294_v11, 5  ;;  %v1259_v31 = vrot.slane %v1257_v57, 4  ;;  %v7203_v47 = vsel %vm6744_vm7, %v4985_v54, %v1257_v57  ;;  %v5306_v57 = vld [vmem:[%s6492_s9 + $0x20] sm:$0x1]  ;;  %v5310_v54 = vld [vmem:[%s6492_s9 + $0x30] sm:$0xf] }
  0xc1   : > { %v4987_v11 = vrot.slane %v1170_v50, 9  ;;  %v3633_v50 = vshll.u32 %v5310_v54, 16  ;;  %v3601_v25 = vshll.u32 %v5306_v57, 16  ;;  %v3639_v36 = vshll.u32 %v5311_v15, 16 }
  0xc2   : > { %v7214_v60 = vsel %vm6744_vm7, %v4986_v41, %v1264_v16  ;;  %v7230_v41 = vsel %vm6744_vm7, %v1259_v31, %v1260_v28  ;;  %v1273_v31 = vrot.slane %v1271_v62, 4  ;;  %v3630_v28 = vshrl.u32 %v5310_v54, 16 }
  0xc3   : > { %v7272_v35 = vrot.slane %v3639_v36, 5 }
  0xc5   : > { %5821 = vmatmul.mubr.msk.bf16.gmra.mrb[4].mxu0 %vm656_vm3, %v6241_v37  ;;  %v1266_v37 = vrot.slane %v1264_v16, 4  ;;  %v6298_v16 = vld [vmem:[%s6492_s9 + $0x68] sm:$0x1] }
  0xc6   : > { %5667 = vmatmul.mubr.msk.bf16.gmra.mrb[20].mxu1 %vm656_vm3, %v4958_v6  ;;  %5824 = vmatprep.mubr.msk.bf16.mxu0 %vm656_vm3, %v6243_v61  ;;  %v3587_v6 = vrot.slane %v3585_v8, 5  ;;  %v6245_v61 = vld [vmem:[%s6492_s9 + $0x54] sm:$0xff]   ;;  %v1274_v40 = vrot.slane %v6298_v16, 5  ;;  %v3615_v8 = vshll.u32 %v5308_v39, 16  ;;  %v3598_v16 = vor.u32 %v3597_v12, %v7224_v7 }
  0xc7   : > { %5670 = vmatprep.mubr.msk.bf16.mxu1 %vm656_vm3, %v4959_v9  ;;  %v3606_v9 = vshrl.u32 %v5307_v24, 16  ;;  %v7239_v44 = vsel %vm6744_vm7, %v1266_v37, %v1267_v55  ;;  %v1281_v24 = vrot.slane %v6300_v17, 5  ;;  %v3643_v39 = vshrl.u32 %v5311_v15, 16 }
  0xc8   : > { %v3588_v10 = vor.u32 %v3587_v6, %v3584_v43  ;;  %v7245_v37 = vrot.slane %v3615_v8, 5  ;;  %v3621_v55 = vrot.slane %v3619_v18, 4  ;;  %v8333_v43 = vcombine.low %v6849_v52, %v6860_v46  ;;  %v6301_v8 = vld [vmem:[%s6492_s9 + $0x7c] sm:$0xf]  ;;  %v7281_v18 = vld [vmem:[%s6492_s9 + $0x38] sm:$0x1] }
  0xc9   : > { %v3608_v38 = vrot.slane %v3606_v9, 4  ;;  %v7254_v17 = vsel %vm6744_vm7, %v4987_v11, %v1271_v62  ;;  %v7258_v57 = vsel %vm6744_vm7, %v1273_v31, %v1274_v40  ;;  %v3632_v6 = vrot.slane %v3630_v28, 4  ;;  %8335 = vst [vmem:[#allocation9_spill] sm:$0xff] %v7281_v18 }
  0xca   : > { %v3635_v12 = vrot.slane %v3633_v50, 5  ;;  %v8334_v52 = vcombine.low %v6881_v33, %v6886_v56  ;;  %v3589_v46 = vrot.slane %v3588_v10, 4  ;;  %v3599_v54 = vrot.slane %v3598_v16, 4  ;;  %v6249_v33 = vld [vmem:[%s6492_s9 + $0x6c] sm:$0xff]   ;;  %v1173_v16 = vld [vmem:[%s6492_s9 + $0x84] sm:$0xe] }
  0xcb   : > { %v3625_v62 = vshll.u32 %v5309_v20, 16  ;;  %v7266_v11 = vsel %vm6744_vm7, %v4988_v5, %v1278_v30  ;;  %v7270_v40 = vsel %vm6744_vm7, %v1280_v48, %v1281_v24  ;;  %v3645_v9 = vrot.slane %v3643_v39, 4  ;;  %v6250_v48 = vld [vmem:[%s6492_s9 + $0x78] sm:$0xff]  }
  0xcc   : > { %v3612_v10 = vor.u32 %v3611_v27, %v3608_v38  ;;  %v3622_v20 = vor.u32 %v3621_v55, %v7245_v37  ;;  %v1285_v30 = vrot.slane %v6301_v8, 5  ;;  %v3636_v38 = vor.u32 %v3635_v12, %v3632_v6  ;;  %v5313_v5 = vld [vmem:[%s6492_s9 + $0x3c] sm:$0xf] }
  0xcd   : > { %5825 = vmatmul.mubr.msk.bf16.gmra.mrb[8].mxu0 %vm656_vm3, %v6245_v61  ;;  %v3603_v61 = vrot.slane %v3601_v25, 5  ;;  %v1172_v25 = vld [vmem:[%s6492_s9 + $0x78] sm:$0xe]  ;;  %v7297_v50 = vrot.slane %v3625_v62, 5  ;;  %v3646_v39 = vor.u32 %v3645_v9, %v7272_v35  ;;  %v3649_v55 = vshll.u32 %v7281_v18, 16 }
  0xce   : > { %5671 = vmatmul.mubr.msk.bf16.gmra.mrb[24].mxu1 %vm656_vm3, %v8333_v43  ;;  %5828 = vmatprep.mubr.msk.bf16.mxu0 %vm656_vm3, %v6247_v21  ;;  %v3594_v21 = vsel %vm6518_vm4, %v3589_v46, %v7224_v7  ;;  %v4989_v24 = vrot.slane %v1172_v25, 9  ;;  %v6302_v43 = vld [vmem:[%s6492_s9 + $0x88] sm:$0xf]  ;;  %v7305_v7 = vld [vmem:[%s6492_s9 + $0x40] sm:$0xf]  ;;  %v3613_v12 = vrot.slane %v3612_v10, 4  ;;  %v8337_v62 = vcombine.low %v6901_v14, %v6910_v42 }
  0xcf   : > { %5674 = vmatprep.mubr.msk.bf16.mxu1 %vm656_vm3, %v8334_v52  ;;  %v3604_v31 = vsel %vm6518_vm4, %v3599_v54, %v3603_v61  ;;  %v1292_v6 = vrot.slane %v6302_v43, 5  ;;  %8336 = vst [vmem:[#allocation10_spill] sm:$0xff] %v7305_v7  ;;  %v3623_v52 = vrot.slane %v3622_v20, 4  ;;  %v1287_v46 = vrot.slane %v1285_v30, 4  ;;  %v6303_v54 = vld [vmem:[%s6492_s9 + $0x80] sm:$0x1] }
  0xd0   : > { %v1288_v61 = vrot.slane %v6303_v54, 5  ;;  %v3637_v9 = vrot.slane %v3636_v38, 4  ;;  %v4990_v25 = vrot.slane %v1173_v16, 9  ;;  %v3654_v8 = vshrl.u32 %v5313_v5, 16  ;;  %v6251_v10 = vld [vmem:[%s6492_s9 + $0x84] sm:$0xff]  }
  0xd1   : > { %v3657_v43 = vshll.u32 %v5313_v5, 16  ;;  %v7319_v20 = vcombine.low %v3594_v21, %v3604_v31  ;;  %v7323_v14 = vsel %vm705_vm0, %v7123_v26, 0  ;;  %v3667_v38 = vshrl.u32 %v7305_v7, 16  ;;  %v6252_v21 = vld [vmem:[%s6492_s9 + $0x90] sm:$0xff]   ;;  %v6308_v18 = vld [vmem:[%s6492_s9 + $0xa0] sm:$0xf] }
  0xd2   : > { %v3647_v16 = vrot.slane %v3646_v39, 4  ;;  %v3651_v5 = vrot.slane %v3649_v55, 5  ;;  %v1294_v54 = vrot.slane %v1292_v6, 4  ;;  %v3618_v31 = vsel %vm6518_vm4, %v3613_v12, %v7245_v37 }
  0xd3   : > { %v3628_v26 = vsel %vm6518_vm4, %v3623_v52, %v7297_v50  ;;  %v7338_v39 = vsel %vm6744_vm7, %v4989_v24, %v1285_v30  ;;  %v7342_v55 = vsel %vm6744_vm7, %v1287_v46, %v1288_v61  ;;  %v3642_v37 = vsel %vm6518_vm4, %v3637_v9, %v7272_v35  ;;  %v5319_v30 = vld [vmem:[%s6492_s9 + $0x54] sm:$0xf]  ;;  %v7359_v24 = vld [vmem:[%s6492_s9 + $0x58] sm:$0xf]  ;;  %v7364_v61 = vld [vmem:[%s6492_s9 + $0x90] sm:$0xe] }
  0xd4   : > { %v7355_v12 = vsel %vm6744_vm7, %v4990_v25, %v1292_v6  ;;  %v3656_v50 = vrot.slane %v3654_v8, 4  ;;  %v3659_v52 = vrot.slane %v3657_v43, 5  ;;  %v3669_v46 = vrot.slane %v3667_v38, 4 }
  0xd5   : > { %5829 = vmatmul.mubr.msk.bf16.gmra.mrb[12].mxu0 %vm656_vm3, %v6249_v33  ;;  %v8338_v33 = vcombine.low %v7108_v0, %v7127_v23  ;;  %v6304_v0 = vld [vmem:[%s6492_s9 + $0x8c] sm:$0x1]  ;;  %v3652_v36 = vsel %vm6518_vm4, %v3647_v16, %v3651_v5  ;;  %v3702_v25 = vshrl.u32 %v5319_v30, 16  ;;  %v3705_v8 = vshll.u32 %v5319_v30, 16 }
  0xd6   : > { %5675 = vmatmul.mubr.msk.bf16.gmra.mrb[28].mxu1 %vm656_vm3, %v8337_v62  ;;  %5832 = vmatprep.mubr.msk.bf16.mxu0 %vm656_vm3, %v6250_v48  ;;  %v3663_v48 = vshll.u32 %v7305_v7, 16  ;;  %v1295_v23 = vrot.slane %v6304_v0, 5  ;;  %v5316_v62 = vld [vmem:[%s6492_s9 + $0x48] sm:$0xf]  ;;  %v7348_v0 = vld [vmem:[%s6492_s9 + $0x4c] sm:$0xf]  ;;  %v8340_v38 = vcombine.low %v7112_v29, %v7116_v53  ;;  %v7382_v16 = vcombine.low %v3618_v31, %v3628_v26 }
  0xd7   : > { %5680 = vmatprep.mubr.msk.bf16.mxu1 %vm656_vm3, %v8338_v33  ;;  %v7345_v33 = vld [vmem:[%s6492_s9 + $0x44] sm:$0x1]  ;;  %v3678_v27 = vshrl.u32 %v5316_v62, 16  ;;  %v3681_v15 = vshll.u32 %v5316_v62, 16  ;;  %v3687_v6 = vshll.u32 %v7348_v0, 16  ;;  %v3691_v9 = vshrl.u32 %v7348_v0, 16 }
  0xd8   : > { %8339 = vst [vmem:[#allocation11_spill] sm:$0xff] %v7345_v33  ;;  %v7361_v28 = vrot.slane %v3663_v48, 5  ;;  %v7370_v35 = vsel %vm6744_vm7, %v1294_v54, %v1295_v23  ;;  %v3711_v43 = vshll.u32 %v7359_v24, 16  ;;  %v3715_v48 = vshrl.u32 %v7359_v24, 16  ;;  %v5322_v31 = vld [vmem:[%s6492_s9 + $0x60] sm:$0xf] }
  0xd9   : > { %v3673_v5 = vshll.u32 %v7345_v33, 16  ;;  %v4991_v54 = vrot.slane %v7364_v61, 9  ;;  %v8341_v23 = vcombine.low %v7153_v34, %v7169_v4  ;;  %v7393_v29 = vcombine.low %v3642_v37, %v3652_v36  ;;  %v6253_v26 = vld [vmem:[%s6492_s9 + $0x9c] sm:$0xff]   ;;  %v6254_v30 = vld [vmem:[%s6492_s9 + $0xa8] sm:$0xff]  }
  0xda   : > { %v3660_v53 = vor.u32 %v3659_v52, %v3656_v50  ;;  %v3680_v62 = vrot.slane %v3678_v27, 4  ;;  %v7404_v34 = vrot.slane %v3687_v6, 5  ;;  %v3693_v4 = vrot.slane %v3691_v9, 4  ;;  %v6305_v36 = vld [vmem:[%s8307_s1 + $0x8] sm:$0x3] }
  0xdb   : > { %v3704_v27 = vrot.slane %v3702_v25, 4  ;;  %v3707_v37 = vrot.slane %v3705_v8, 5  ;;  %v7413_v50 = vrot.slane %v3711_v43, 5  ;;  %v3717_v52 = vrot.slane %v3715_v48, 4  ;;  %v6306_v6 = vld [vmem:[%s6492_s9 + $0x94] sm:$0xf] }
  0xdc   : > { %v7419_v9 = vld [vmem:[%s6492_s9 + $0x64] sm:$0xf]  ;;  %v3726_v61 = vshrl.u32 %v5322_v31, 16  ;;  %v7421_v22 = vrot.slane %v3660_v53, 4  ;;  %v1306_v25 = vrot.slane %v6308_v18, 5  ;;  %v3694_v43 = vor.u32 %v3693_v4, %v7404_v34 }
  0xdd   : > { %5833 = vmatmul.mubr.msk.bf16.gmra.mrb[16].mxu0 %vm656_vm3, %v6251_v10  ;;  %8342 = vst [vmem:[#allocation12_spill] sm:$0xff] %v7419_v9  ;;  %v3729_v10 = vshll.u32 %v5322_v31, 16  ;;  %v3708_v31 = vor.u32 %v3707_v37, %v3704_v27  ;;  %v3718_v53 = vor.u32 %v3717_v52, %v7413_v50  ;;  %v8343_v18 = vcombine.low %v7160_v19, %v7173_v58  ;;  %v6255_v37 = vld [vmem:[%s6492_s9 + $0xb4] sm:$0xff]  }
  0xde   : > { %5681 = vmatmul.mubr.msk.bf16.vlgmr.msra.gmra.mrb[0].mxu1 %vm656_vm3, %v8340_v38  ;;  %5836 = vmatprep.mubr.msk.bf16.mxu0 %vm656_vm3, %v6252_v21  ;;  %v3683_v21 = vrot.slane %v3681_v15, 5  ;;  %v7402_v38 = vld [vmem:[%s6492_s9 + $0x50] sm:$0x1]  ;;  %v7411_v15 = vld [vmem:[%s6492_s9 + $0x5c] sm:$0x1]  ;;  %v8344_v27 = vcombine.low %v7178_v2, %v7182_v1  ;;  %v1308_v52 = vrot.slane %v1306_v25, 4 }
  0xdf   : > { %5713 = vmatpush3.bf16.msra.mxu1 %v7149_v49  ;;  %5684 = vmatprep.mubr.msk.bf16.mxu1 %vm656_vm3, %v8341_v23  ;;  %v3670_v49 = vor.u32 %v3669_v46, %v7361_v28  ;;  %v7415_v46 = vrot.slane %v3673_v5, 5  ;;  %v1299_v23 = vrot.slane %v6306_v6, 5  ;;  %v3697_v48 = vshll.u32 %v7402_v38, 16  ;;  %v1175_v5 = vld [vmem:[%s6492_s9 + $0x9c] sm:$0xe] }
  0xe0   : > { %6179 = vmatprep.subr.msk.bf16.mxu1 %vm705_vm0, %v6305_v36  ;;  %v6307_v36 = vld [vmem:[%s6492_s9 + $0x98] sm:$0x1]  ;;  %v3684_v7 = vor.u32 %v3683_v21, %v3680_v62  ;;  %v3721_v6 = vshll.u32 %v7411_v15, 16  ;;  %v3739_v62 = vshrl.u32 %v7419_v9, 16  ;;  %v3731_v4 = vrot.slane %v3729_v10, 5 }
  0xe1   : > { %v1302_v33 = vrot.slane %v6307_v36, 5  ;;  %v3671_v8 = vrot.slane %v3670_v49, 4  ;;  %v3735_v36 = vshll.u32 %v7419_v9, 16  ;;  %v7440_v21 = vsel %vm6744_vm7, %v4991_v54, %v1299_v23  ;;  %v7451_v2 = vld [vmem:[%s6492_s9 + $0x68] sm:$0x1] }
  0xe2   : > { %v3728_v49 = vrot.slane %v3726_v61, 4  ;;  %v3685_v19 = vrot.slane %v3684_v7, 4  ;;  %v4992_v58 = vrot.slane %v1175_v5, 9  ;;  %v3695_v3 = vrot.slane %v3694_v43, 4  ;;  %8345 = vst [vmem:[#allocation13_spill] sm:$0xff] %v7451_v2  ;;  %v6256_v5 = vld [vmem:[%s6492_s9 + $0xc0] sm:$0xff]  }
  0xe3   : > { %v3699_v54 = vrot.slane %v3697_v48, 5  ;;  %v3723_v63 = vrot.slane %v3721_v6, 5  ;;  %v1313_v61 = vrot.slane %v6886_v56, 5  ;;  %v3709_v10 = vrot.slane %v3708_v31, 4  ;;  %v1177_v31 = vld [vmem:[%s6492_s9 + $0xb4] sm:$0xe] }
  0xe4   : > { %v3719_v51 = vrot.slane %v3718_v53, 4  ;;  %v7453_v1 = vrot.slane %v3735_v36, 5  ;;  %v3741_v7 = vrot.slane %v3739_v62, 4  ;;  %v3666_v43 = vsel %vm6518_vm4, %v7421_v22, %v7361_v28  ;;  %v6310_v62 = vld [vmem:[%s6492_s9 + $0xb0] sm:$0x1] }
  0xe5   : > { %5837 = vmatmul.mubr.msk.bf16.gmra.mrb[20].mxu0 %vm656_vm3, %v6253_v26  ;;  %v1301_v26 = vrot.slane %v1299_v23, 4  ;;  %v1176_v23 = vld [vmem:[%s6492_s9 + $0xa8] sm:$0xe]  ;;  %v3676_v48 = vsel %vm6518_vm4, %v3671_v8, %v7415_v46  ;;  %v3732_v6 = vor.u32 %v3731_v4, %v3728_v49  ;;  %v3690_v53 = vsel %vm6518_vm4, %v3685_v19, %v7404_v34  ;;  %v5325_v46 = vld [vmem:[%s6492_s9 + $0x6c] sm:$0xf] }
  0xe6   : > { %5685 = vmatmul.mubr.msk.bf16.gmra.mrb[4].mxu1 %vm656_vm3, %v8343_v18  ;;  %5840 = vmatprep.mubr.msk.bf16.mxu0 %vm656_vm3, %v6254_v30  ;;  %v6309_v18 = vld [vmem:[%s6492_s9 + $0xa4] sm:$0x1]  ;;  %v7473_v36 = vsel %vm6744_vm7, %v4992_v58, %v1306_v25  ;;  %v4993_v28 = vrot.slane %v1176_v23, 9  ;;  %v1315_v8 = vrot.slane %v1313_v61, 4  ;;  %v3745_v49 = vshll.u32 %v7451_v2, 16 }
  0xe7   : > { %5688 = vmatprep.mubr.msk.bf16.mxu1 %vm656_vm3, %v8344_v27  ;;  %v1309_v30 = vrot.slane %v6309_v18, 5  ;;  %v7465_v56 = vsel %vm6744_vm7, %v1301_v26, %v1302_v33  ;;  %v3700_v33 = vsel %vm6518_vm4, %v3695_v3, %v3699_v54  ;;  %v1316_v26 = vrot.slane %v6310_v62, 5  ;;  %v5328_v18 = vld [vmem:[%s6492_s9 + $0x78] sm:$0xf]  ;;  %v7528_v54 = vld [vmem:[%s6492_s9 + $0xbc] sm:$0x1] }
  0xe8   : > { %v3714_v34 = vsel %vm6518_vm4, %v3709_v10, %v7413_v50  ;;  %v3724_v25 = vsel %vm6518_vm4, %v3719_v51, %v3723_v63  ;;  %v3742_v4 = vor.u32 %v3741_v7, %v7453_v1  ;;  %v4994_v27 = vrot.slane %v1177_v31, 9  ;;  %v7502_v51 = vld [vmem:[%s6492_s9 + $0x70] sm:$0xf]  ;;  %v7532_v10 = vld [vmem:[%s6492_s9 + $0x7c] sm:$0xf] }
  0xe9   : > { %v7477_v22 = vsel %vm6744_vm7, %v1308_v52, %v1309_v30  ;;  %v8347_v3 = vcombine.low %v7195_v45, %v7199_v59  ;;  %v7498_v19 = vrot.slane %v3732_v6, 4  ;;  %v1320_v50 = vrot.slane %v6910_v42, 5  ;;  %8348 = vst [vmem:[#allocation15_spill] sm:$0xff] %v7502_v51  ;;  %8350 = vst [vmem:[#allocation16_spill] sm:$0xff] %v7532_v10  ;;  %v5331_v7 = vld [vmem:[%s6492_s9 + $0x84] sm:$0xf] }
  0xea   : > { %8346 = vst [vmem:[#allocation14_spill] sm:$0xff] %v7477_v22  ;;  %v3750_v63 = vshrl.u32 %v5325_v46, 16  ;;  %v8349_v45 = vcombine.low %v7203_v47, %v7230_v41  ;;  %v7510_v58 = vcombine.low %v3690_v53, %v3700_v33  ;;  %v7516_v42 = vsel %vm6744_vm7, %v4993_v28, %v1313_v61  ;;  %v6257_v61 = vld [vmem:[%s6492_s9 + $0xcc] sm:$0xff]   ;;  %v7544_v31 = vld [vmem:[%s6492_s9 + $0x88] sm:$0xf] }
  0xeb   : > { %v7519_v30 = vcombine.low %v3714_v34, %v3724_v25  ;;  %v7523_v47 = vsel %vm6744_vm7, %v1315_v8, %v1316_v26  ;;  %v7525_v41 = vrot.slane %v3745_v49, 5  ;;  %v3759_v6 = vshll.u32 %v7502_v51, 16  ;;  %8351 = vst [vmem:[#allocation17_spill] sm:$0xff] %v7544_v31  ;;  %v5334_v62 = vld [vmem:[%s6492_s9 + $0x90] sm:$0xf] }
  0xec   : > { %v7550_v28 = vrot.slane %v1320_v50, 4  ;;  %v7552_v33 = vrot.slane %v3750_v63, 4  ;;  %v3763_v8 = vshrl.u32 %v7502_v51, 16  ;;  %v3774_v26 = vshrl.u32 %v5328_v18, 16  ;;  %v7559_v25 = vld [vmem:[%s6492_s9 + $0x94] sm:$0xf] }
  0xed   : > { %5841 = vmatmul.mubr.msk.bf16.gmra.mrb[24].mxu0 %vm656_vm3, %v6255_v37  ;;  %v7496_v37 = vcombine.low %v3666_v43, %v3676_v48  ;;  %v7540_v43 = vsel %vm6744_vm7, %v4994_v27, %v1320_v50  ;;  %v3753_v48 = vshll.u32 %v5325_v46, 16  ;;  %v3777_v49 = vshll.u32 %v5328_v18, 16  ;;  %8352 = vst [vmem:[#allocation18_spill] sm:$0xff] %v7559_v25  ;;  %v7597_v2 = vld [vmem:[%s6492_s9 + $0x8c] sm:$0x1] }
  0xee   : > { %5689 = vmatmul.mubr.msk.bf16.gmra.mrb[8].mxu1 %vm656_vm3, %v8347_v3  ;;  %5844 = vmatprep.mubr.msk.bf16.mxu0 %vm656_vm3, %v6256_v5  ;;  %v7536_v5 = vrot.slane %v3742_v4, 4  ;;  %v3783_v46 = vshll.u32 %v7532_v10, 16  ;;  %v3787_v34 = vshrl.u32 %v7532_v10, 16  ;;  %v3798_v4 = vshrl.u32 %v5331_v7, 16 }
  0xef   : > { %5692 = vmatprep.mubr.msk.bf16.mxu1 %vm656_vm3, %v8349_v45  ;;  %v3801_v27 = vshll.u32 %v5331_v7, 16  ;;  %v3807_v3 = vshll.u32 %v7544_v31, 16  ;;  %v3811_v50 = vshrl.u32 %v7544_v31, 16  ;;  %v7569_v45 = vld [vmem:[%s6492_s9 + $0x74] sm:$0x1]  ;;  %v3755_v18 = vrot.slane %v3753_v48, 5 }
  0xf0   : > { %v3822_v52 = vshrl.u32 %v5334_v62, 16  ;;  %v3825_v53 = vshll.u32 %v5334_v62, 16  ;;  %v8353_v7 = vcombine.low %v7214_v60, %v7239_v44  ;;  %v3765_v59 = vrot.slane %v3763_v8, 4  ;;  %v5337_v48 = vld [vmem:[%s6492_s9 + $0x9c] sm:$0xf] }
  0xf1   : > { %v3831_v63 = vshll.u32 %v7559_v25, 16  ;;  %v3835_v23 = vshrl.u32 %v7559_v25, 16  ;;  %v8354_v62 = vcombine.low %v7254_v17, %v7258_v57  ;;  %v7587_v44 = vld [vmem:[%s6492_s9 + $0x80] sm:$0x1]  ;;  %v3776_v60 = vrot.slane %v3774_v26, 4 }
  0xf2   : > { %8355 = vst [vmem:[#allocation19_spill] sm:$0xff] %v7587_v44  ;;  %v3800_v31 = vrot.slane %v3798_v4, 4  ;;  %v3803_v8 = vrot.slane %v3801_v27, 5  ;;  %v7591_v10 = vrot.slane %v3807_v3, 5  ;;  %v3813_v51 = vrot.slane %v3811_v50, 4 }
  0xf3   : > { %v7594_v25 = vld [vmem:[%s6492_s9 + $0xa0] sm:$0xf]  ;;  %v3824_v17 = vrot.slane %v3822_v52, 4  ;;  %v3827_v57 = vrot.slane %v3825_v53, 5  ;;  %v3849_v9 = vshll.u32 %v5337_v48, 16  ;;  %v3756_v26 = vor.u32 %v3755_v18, %v7552_v33 }
  0xf4   : > { %v3793_v27 = vshll.u32 %v7587_v44, 16  ;;  %v7606_v3 = vld [vmem:[%s6492_s9 + $0x98] sm:$0x1]  ;;  %v3855_v50 = vshll.u32 %v7594_v25, 16  ;;  %v3859_v52 = vshrl.u32 %v7594_v25, 16  ;;  %v3804_v22 = vor.u32 %v3803_v8, %v3800_v31 }
  0xf5   : > { %5845 = vmatmul.mubr.msk.bf16.gmra.mrb[28].mxu0 %vm656_vm3, %v6257_v61  ;;  %v7577_v61 = vrot.slane %v3759_v6, 5  ;;  %v3789_v6 = vrot.slane %v3787_v34, 4  ;;  %v3837_v34 = vrot.slane %v3835_v23, 4  ;;  %v3817_v33 = vshll.u32 %v7597_v2, 16 }
  0xf6   : > { %5693 = vmatmul.mubr.msk.bf16.gmra.mrb[12].mxu1 %vm656_vm3, %v8353_v7  ;;  %5850 = vmatprep.mubr.msk.bf16.mxu0 %vm656_vm3, %v7319_v20  ;;  %v3779_v7 = vrot.slane %v3777_v49, 5  ;;  %v7589_v20 = vrot.slane %v3783_v46, 5  ;;  %v3769_v49 = vshll.u32 %v7569_v45, 16  ;;  %v7601_v46 = vrot.slane %v3831_v63, 5 }
  0xf7   : > { %5696 = vmatprep.mubr.msk.bf16.mxu1 %vm656_vm3, %v8354_v62  ;;  %v3846_v62 = vshrl.u32 %v5337_v48, 16  ;;  %v3766_v4 = vor.u32 %v3765_v59, %v7577_v61  ;;  %v3814_v23 = vor.u32 %v3813_v51, %v7591_v10  ;;  %v3828_v59 = vor.u32 %v3827_v57, %v3824_v17  ;;  %v7639_v57 = vld [vmem:[%s6492_s9 + $0xa4] sm:$0x1] }
  0xf8   : > { %v3780_v53 = vor.u32 %v3779_v7, %v3776_v60  ;;  %v3790_v48 = vor.u32 %v3789_v6, %v7589_v20  ;;  %v3851_v18 = vrot.slane %v3849_v9, 5  ;;  %v8356_v44 = vcombine.low %v7266_v11, %v7270_v40 }
  0xf9   : > { %v3848_v63 = vrot.slane %v3846_v62, 4  ;;  %v8357_v31 = vrot.slane %v7528_v54, 5  ;;  %v3771_v51 = vrot.slane %v3769_v49, 5  ;;  %v3838_v60 = vor.u32 %v3837_v34, %v7601_v46  ;;  %v7642_v34 = vld [vmem:[%s6492_s9 + $0xac] sm:$0xf] }
  0xfa   : > { %v3841_v9 = vshll.u32 %v7606_v3, 16  ;;  %v8358_v11 = vcombine.low %v7338_v39, %v7342_v55  ;;  %v3757_v40 = vrot.slane %v3756_v26, 4  ;;  %v7635_v54 = vrot.slane %v3855_v50, 5 }
  0xfb   : > { %v3781_v7 = vrot.slane %v3780_v53, 4  ;;  %v3791_v6 = vrot.slane %v3790_v48, 4  ;;  %v3795_v8 = vrot.slane %v3793_v27, 5  ;;  %v3819_v17 = vrot.slane %v3817_v33, 5  ;;  %v7652_v48 = vld [vmem:[%s6492_s9 + $0xb0] sm:$0x1] }
  0xfc   : > { %v3805_v39 = vrot.slane %v3804_v22, 4  ;;  %v3815_v55 = vrot.slane %v3814_v23, 4  ;;  %v3829_v62 = vrot.slane %v3828_v59, 4  ;;  %v3852_v49 = vor.u32 %v3851_v18, %v3848_v63 }
  0xfd   : > { %5851 = vmatmul.mubr.msk.bf16.vlgmr.msra.gmra.mrb[0].mxu0 %vm656_vm3, %v7382_v16  ;;  %v7625_v16 = vsel %vm6744_vm7, %v7550_v28, %v8357_v31  ;;  %v3861_v28 = vrot.slane %v3859_v52, 4  ;;  %v3843_v26 = vrot.slane %v3841_v9, 5  ;;  %v3762_v52 = vsel %vm6518_vm4, %v3757_v40, %v7577_v61 }
  0xfe   : > { %5697 = vmatmul.mubr.msk.bf16.gmra.mrb[16].mxu1 %vm656_vm3, %v8356_v44  ;;  %5883 = vmatpush3.bf16.msra.mxu0 %v7323_v14  ;;  %v3767_v14 = vrot.slane %v3766_v4, 4  ;;  %v5340_v44 = vld [vmem:[%s6492_s9 + $0xa8] sm:$0xf]  ;;  %v3865_v22 = vshll.u32 %v7639_v57, 16  ;;  %v3786_v33 = vsel %vm6518_vm4, %v3781_v7, %v7589_v20  ;;  %v3796_v23 = vsel %vm6518_vm4, %v3791_v6, %v3795_v8 }
  0xff   : > { %5700 = vmatprep.mubr.msk.bf16.mxu1 %vm656_vm3, %v8358_v11  ;;  %5854 = vmatprep.mubr.msk.bf16.mxu0 %vm656_vm3, %v7393_v29  ;;  %v3839_v29 = vrot.slane %v3838_v60, 4  ;;  %v3870_v4 = vshrl.u32 %v5340_v44, 16  ;;  %v3873_v50 = vshll.u32 %v5340_v44, 16  ;;  %v3862_v53 = vor.u32 %v3861_v28, %v7635_v54  ;;  %v5389_v11 = vld [vmem:[%s6492_s9 + $0x48] sm:$0xe] }
 0x100   : > { %v3772_v27 = vsel %vm6518_vm4, %v3767_v14, %v3771_v51  ;;  %v3879_v59 = vshll.u32 %v7642_v34, 16  ;;  %v3883_v61 = vshrl.u32 %v7642_v34, 16  ;;  %v3810_v63 = vsel %vm6518_vm4, %v3805_v39, %v7591_v10  ;;  %v7717_v39 = vld [vmem:[%s6492_s9 + $0xb8] sm:$0xf] }
 0x101   : > { %v3820_v18 = vsel %vm6518_vm4, %v3815_v55, %v3819_v17  ;;  %v3834_v20 = vsel %vm6518_vm4, %v3829_v62, %v7601_v46  ;;  %v3853_v31 = vrot.slane %v3852_v49, 4  ;;  %v8359_v51 = vcombine.low %v7355_v12, %v7370_v35 }
 0x102   : > { %v3872_v10 = vrot.slane %v3870_v4, 4  ;;  %v3875_v60 = vrot.slane %v3873_v50, 5  ;;  %v3889_v9 = vshll.u32 %v7652_v48, 16  ;;  %v8360_v46 = vcombine.low %v7440_v21, %v7465_v56  ;;  %v5343_v21 = vld [vmem:[%s6492_s9 + $0xb4] sm:$0xf] }
 0x103   : > { %v5010_v12 = vcombine.low %v7516_v42, %v7523_v47  ;;  %v8361_v35 = vsel %vm6518_vm4, %v7536_v5, %v7525_v41  ;;  %v3863_v14 = vrot.slane %v3862_v53, 4  ;;  %v3867_v28 = vrot.slane %v3865_v22, 5  ;;  %v5391_v4 = vld [vmem:[%s6492_s9 + $0x60] sm:$0xe]  ;;  %v5392_v53 = vld [vmem:[%s6492_s9 + $0x6c] sm:$0xe] }
 0x104   : > { %v5011_v56 = vcombine.low %v7540_v43, %v7625_v16  ;;  %v7700_v44 = vcombine.low %v3762_v52, %v3772_v27  ;;  %v7702_v42 = vrot.slane %v3879_v59, 5  ;;  %v3885_v47 = vrot.slane %v3883_v61, 4  ;;  %v8370_v16 = vld [vmem:[#allocation7_spill] sm:$0xff] }
 0x105   : > { %5855 = vmatmul.mubr.msk.bf16.gmra.mrb[4].mxu0 %vm656_vm3, %v7496_v37  ;;  %v3844_v37 = vsel %vm6518_vm4, %v3839_v29, %v3843_v26  ;;  %v7704_v41 = vcombine.low %v3786_v33, %v3796_v23  ;;  %v7706_v5 = vcombine.low %v3810_v63, %v3820_v18  ;;  %v3858_v6 = vsel %vm6518_vm4, %v3853_v31, %v7635_v54  ;;  %v8363_v23 = vld [vmem:[#allocation14_spill] sm:$0xff]  ;;  %v5346_v63 = vld [vmem:[%s6492_s9 + $0xc0] sm:$0xf]  ;;  %v8365_v18 = vld [vmem:[#allocation12_spill] sm:$0xff] }
 0x106   : > { %5701 = vmatmul.mubr.msk.bf16.gmra.mrb[20].mxu1 %vm656_vm3, %v8359_v51  ;;  %5858 = vmatprep.mubr.msk.bf16.mxu0 %vm656_vm3, %v7510_v58  ;;  %v8362_v58 = vsel %vm6518_vm4, %v7498_v19, %v7453_v1  ;;  %v7708_v7 = vcombine.low %v3834_v20, %v3844_v37  ;;  %v5405_v1 = vrot.slane %v5389_v11, 9  ;;  %v5390_v19 = vld [vmem:[%s6492_s9 + $0x54] sm:$0xe]  ;;  %v3876_v8 = vor.u32 %v3875_v60, %v3872_v10 }
 0x107   : > { %5704 = vmatprep.mubr.msk.bf16.mxu1 %vm656_vm3, %v8360_v46  ;;  %v5359_v40 = vcombine.low %v8362_v58, %v8361_v35  ;;  %v7714_v17 = vrot.slane %v3889_v9, 5  ;;  %v3894_v55 = vshrl.u32 %v5343_v21, 16  ;;  %v3868_v62 = vsel %vm6518_vm4, %v3863_v14, %v3867_v28  ;;  %v8366_v31 = vld [vmem:[#allocation13_spill] sm:$0xff]  ;;  %v8367_v9 = vld [vmem:[#allocation15_spill] sm:$0xff]  ;;  %v7766_v35 = vld [vmem:[%s6492_s9 + $0xbc] sm:$0x1] }
 0x108   : > { %v3897_v49 = vshll.u32 %v5343_v21, 16  ;;  %v4353_v29 = vrot.slane %v7348_v0, 5  ;;  %v4356_v26 = vrot.slane %v7402_v38, 5  ;;  %v3886_v50 = vor.u32 %v3885_v47, %v7702_v42  ;;  %v7769_v58 = vld [vmem:[%s6492_s9 + $0xc4] sm:$0xf] }
 0x109   : > { %v5406_v52 = vrot.slane %v5390_v19, 9  ;;  %v4360_v54 = vrot.slane %v7359_v24, 5  ;;  %v4363_v27 = vrot.slane %v7411_v15, 5  ;;  %v3903_v22 = vshll.u32 %v7717_v39, 16  ;;  %v5393_v19 = vld [vmem:[%s6492_s9 + $0x78] sm:$0xe] }
 0x10a   : > { %v3907_v33 = vshrl.u32 %v7717_v39, 16  ;;  %v7734_v0 = vsel %vm6744_vm7, %v5405_v1, %v4353_v29  ;;  %v4355_v38 = vrot.slane %v4353_v29, 4  ;;  %v8364_v59 = vcombine.low %v7473_v36, %v8363_v23  ;;  %v8368_v23 = vld [vmem:[#allocation16_spill] sm:$0xff] }
 0x10b   : > { %v7741_v24 = vcombine.low %v3858_v6, %v3868_v62  ;;  %v7745_v15 = vsel %vm6744_vm7, %v5406_v52, %v4360_v54  ;;  %v5407_v61 = vrot.slane %v5391_v4, 9  ;;  %v4367_v20 = vrot.slane %v8365_v18, 5  ;;  %v6258_v6 = vld [vmem:[%s6492_s9 + $0xc] sm:$0xff]  }
 0x10c   : > { %v7751_v36 = vsel %vm6744_vm7, %v4355_v38, %v4356_v26  ;;  %v4370_v51 = vrot.slane %v8366_v31, 5  ;;  %v5408_v37 = vrot.slane %v5392_v53, 9  ;;  %v4374_v11 = vrot.slane %v8367_v9, 5 }
 0x10d   : > { %5859 = vmatmul.mubr.msk.bf16.gmra.mrb[8].mxu0 %vm656_vm3, %v7519_v30  ;;  %v4362_v30 = vrot.slane %v4360_v54, 4  ;;  %v5422_v10 = vcombine.low %v7734_v0, %v7751_v36  ;;  %v4377_v46 = vrot.slane %v7569_v45, 5  ;;  %v7775_v14 = vsel %vm6744_vm7, %v5407_v61, %v4367_v20 }
 0x10e   : > { %5705 = vmatmul.mubr.msk.bf16.gmra.mrb[24].mxu1 %vm656_vm3, %v8364_v59  ;;  %5862 = vmatprep.mubr.msk.bf16.mxu0 %vm656_vm3, %v5359_v40  ;;  %v4369_v28 = vrot.slane %v4367_v20, 4  ;;  %v7777_v21 = vrot.slane %v3894_v55, 4  ;;  %v3918_v47 = vshrl.u32 %v5346_v63, 16  ;;  %v7781_v45 = vsel %vm6744_vm7, %v5408_v37, %v4374_v11  ;;  %v5120_v55 = vld [vmem:[%s6492_s9 + $0x78] sm:$0xf]  ;;  %v8369_v59 = vld [vmem:[#allocation19_spill] sm:$0xff] }
 0x10f   : > { %5708 = vmatprep.mubr.msk.bf16.mxu1 %vm656_vm3, %v5010_v12  ;;  %v7759_v60 = vsel %vm6744_vm7, %v4362_v30, %v4363_v27  ;;  %v7763_v12 = vrot.slane %v3876_v8, 4  ;;  %v4376_v1 = vrot.slane %v4374_v11, 4  ;;  %v7785_v8 = vrot.slane %v3886_v50, 4 }
 0x110   : > { %v5423_v40 = vcombine.low %v7745_v15, %v7759_v60  ;;  %v7787_v62 = vrot.slane %v3897_v49, 5  ;;  %v3921_v29 = vshll.u32 %v5346_v63, 16  ;;  %v7791_v26 = vsel %vm6744_vm7, %v4369_v28, %v4370_v51  ;;  %v8372_v28 = vld [vmem:[#allocation17_spill] sm:$0xff]  ;;  %v6321_v60 = vld [vmem:[%s6492_s9 + $0xa0] sm:$0xf] }
 0x111   : > { %v7794_v4 = vrot.slane %v3903_v22, 5  ;;  %v7796_v52 = vrot.slane %v3907_v33, 4  ;;  %v5424_v54 = vcombine.low %v7775_v14, %v7791_v26  ;;  %v7802_v27 = vsel %vm6744_vm7, %v4376_v1, %v4377_v46  ;;  %v5394_v33 = vld [vmem:[%s6492_s9 + $0x84] sm:$0xe]  ;;  %v6259_v1 = vld [vmem:[%s6492_s9 + $0x18] sm:$0xff]  }
 0x112   : > { %v3913_v49 = vshll.u32 %v7766_v35, 16  ;;  %v3927_v50 = vshll.u32 %v7769_v58, 16  ;;  %v5425_v53 = vcombine.low %v7781_v45, %v7802_v27  ;;  %v5409_v22 = vrot.slane %v5393_v19, 9  ;;  %v6325_v27 = vld [vmem:[%s6492_s9 + $0xac] sm:$0xf] }
 0x113   : > { %v3920_v38 = vrot.slane %v3918_v47, 4  ;;  %v4384_v30 = vrot.slane %v8369_v59, 5  ;;  %v2243_v61 = vshrl.u32 %v5120_v55, 16  ;;  %v3923_v63 = vrot.slane %v3921_v29, 5  ;;  %v5349_v29 = vld [vmem:[%s6492_s9 + $0xcc] sm:$0xf] }
 0x114   : > { %v3931_v18 = vshrl.u32 %v7769_v58, 16  ;;  %v2246_v43 = vshll.u32 %v5120_v55, 16  ;;  %v5410_v37 = vrot.slane %v5394_v33, 9  ;;  %v3882_v9 = vsel %vm6518_vm4, %v7763_v12, %v7702_v42  ;;  %v7845_v55 = vld [vmem:[%s6492_s9 + $0xd0] sm:$0xf] }
 0x115   : > { %5863 = vmatmul.mubr.msk.bf16.gmra.mrb[12].mxu0 %vm656_vm3, %v7700_v44  ;;  %v4381_v44 = vrot.slane %v8368_v23, 5  ;;  %v2245_v51 = vrot.slane %v2243_v61, 4  ;;  %v3900_v11 = vor.u32 %v7787_v62, %v7777_v21  ;;  %v4388_v47 = vrot.slane %v8372_v28, 5  ;;  %v6260_v21 = vld [vmem:[%s6492_s9 + $0x24] sm:$0xff]  }
 0x116   : > { %5709 = vmatmul.mubr.msk.bf16.gmra.mrb[28].mxu1 %vm656_vm3, %v5011_v56  ;;  %5866 = vmatprep.mubr.msk.bf16.mxu0 %vm656_vm3, %v7704_v41  ;;  %v8371_v56 = vld [vmem:[#allocation8_spill] sm:$0xff]  ;;  %v2248_v46 = vrot.slane %v2246_v43, 5  ;;  %v3892_v19 = vsel %vm6518_vm4, %v7785_v8, %v7714_v17  ;;  %v4391_v12 = vrot.slane %v7597_v2, 5  ;;  %v7853_v62 = vrot.slane %v3927_v50, 5  ;;  %v5395_v8 = vld [vmem:[%s6492_s9 + $0x90] sm:$0xe] }
 0x117   : > { %5714 = vmatprep.mubr.msk.bf16.mxu1 %vm656_vm3, %v6258_v6  ;;  %v2265_v41 = vsel %vm6518_vm4, %v8371_v56, %v8370_v16  ;;  %v7827_v20 = vsel %vm6744_vm7, %v5409_v22, %v4381_v44  ;;  %v4383_v31 = vrot.slane %v4381_v44, 4  ;;  %v3910_v6 = vor.u32 %v7796_v52, %v7794_v4  ;;  %v7859_v52 = vld [vmem:[%s6492_s9 + $0xc8] sm:$0x1]  ;;  %v8374_v16 = vld [vmem:[#allocation5_spill] sm:$0xff] }
 0x118   : > { %v3933_v22 = vrot.slane %v3931_v18, 4  ;;  %v2249_v17 = vor.u32 %v2248_v46, %v2245_v51  ;;  %v3915_v23 = vrot.slane %v3913_v49, 5  ;;  %v3924_v44 = vor.u32 %v3923_v63, %v3920_v38  ;;  %v8375_v51 = vld [vmem:[#allocation6_spill] sm:$0xff] }
 0x119   : > { %v7849_v42 = vsel %vm6744_vm7, %v4383_v31, %v4384_v30  ;;  %v7863_v59 = vsel %vm6744_vm7, %v5410_v37, %v4388_v47  ;;  %v4390_v30 = vrot.slane %v4388_v47, 4  ;;  %v3942_v2 = vshrl.u32 %v5349_v29, 16 }
 0x11a   : > { %v5426_v33 = vcombine.low %v7827_v20, %v7849_v42  ;;  %v3945_v50 = vshll.u32 %v5349_v29, 16  ;;  %v3951_v61 = vshll.u32 %v7845_v55, 16  ;;  %v2250_v18 = vrot.slane %v2249_v17, 4  ;;  %v6261_v29 = vld [vmem:[%s6492_s9 + $0x30] sm:$0xff]  }
 0x11b   : > { %v3955_v49 = vshrl.u32 %v7845_v55, 16  ;;  %v7874_v38 = vsel %vm6744_vm7, %v4390_v30, %v4391_v12  ;;  %v5411_v63 = vrot.slane %v5395_v8, 9  ;;  %v3934_v56 = vor.u32 %v3933_v22, %v7853_v62 }
 0x11c   : > { %v3937_v31 = vshll.u32 %v7859_v52, 16  ;;  %v5427_v37 = vcombine.low %v7863_v59, %v7874_v38  ;;  %v5365_v46 = vcombine.low %v3882_v9, %v3892_v19  ;;  %v3901_v28 = vrot.slane %v3900_v11, 4  ;;  %v5396_v11 = vld [vmem:[%s6492_s9 + $0x9c] sm:$0xe] }
 0x11d   : > { %5867 = vmatmul.mubr.msk.bf16.gmra.mrb[16].mxu0 %vm656_vm3, %v7706_v5  ;;  %v8373_v5 = vld [vmem:[#allocation18_spill] sm:$0xff]  ;;  %v3911_v47 = vrot.slane %v3910_v6, 4  ;;  %v3925_v12 = vrot.slane %v3924_v44, 4  ;;  %v4398_v8 = vrot.slane %v7606_v3, 5  ;;  %v3944_v30 = vrot.slane %v3942_v2, 4 }
 0x11e   : > { %5715 = vmatmul.mubr.msk.bf16.vlgmr.msra.gmra.mrb[0].mxu1 %vm656_vm3, %v6259_v1  ;;  %5870 = vmatprep.mubr.msk.bf16.mxu0 %vm656_vm3, %v7708_v7  ;;  %v4395_v43 = vrot.slane %v8373_v5, 5  ;;  %v2255_v7 = vsel %vm6518_vm4, %v2250_v18, %v8375_v51  ;;  %v3947_v18 = vrot.slane %v3945_v50, 5  ;;  %v7897_v5 = vrot.slane %v3951_v61, 5  ;;  %v6262_v19 = vld [vmem:[%s6492_s9 + $0x3c] sm:$0xff]  }
 0x11f   : > { %5917 = vmatpush3.bf16.msra.mxu1 %v8374_v16  ;;  %5718 = vmatprep.mubr.msk.bf16.mxu1 %vm656_vm3, %v6260_v21  ;;  %v7886_v1 = vcombine.low %v2255_v7, %v2265_v41  ;;  %v7890_v21 = vld [vmem:[%s6492_s9 + $0xd4] sm:$0x1]  ;;  %v3957_v9 = vrot.slane %v3955_v49, 4  ;;  %v3935_v41 = vrot.slane %v3934_v56, 4  ;;  %v3939_v6 = vrot.slane %v3937_v31, 5 }
 0x120   : > { %v7894_v22 = vsel %vm6744_vm7, %v5411_v63, %v4395_v43  ;;  %v4397_v17 = vrot.slane %v4395_v43, 4  ;;  %v3906_v63 = vsel %vm6518_vm4, %v3901_v28, %v7794_v4  ;;  %v3916_v2 = vsel %vm6518_vm4, %v3911_v47, %v3915_v23  ;;  %v6312_v16 = vld [vmem:[%s6492_s9 + $0x1c] sm:$0xf]  ;;  %v5397_v28 = vld [vmem:[%s6492_s9 + $0xa8] sm:$0xe] }
 0x121   : > { %v3961_v50 = vshll.u32 %v7890_v21, 16  ;;  %v5412_v61 = vrot.slane %v5396_v11, 9  ;;  %v4402_v49 = vrot.slane %v7594_v25, 5  ;;  %v3930_v4 = vsel %vm6518_vm4, %v3925_v12, %v7853_v62  ;;  %v5385_v62 = vld [vmem:[%s6492_s9 + $0x18] sm:$0xe]  ;;  %v6263_v47 = vld [vmem:[%s6492_s9 + $0x48] sm:$0xff]  }
 0x122   : > { %v7903_v44 = vsel %vm6744_vm7, %v4397_v17, %v4398_v8  ;;  %v3958_v43 = vor.u32 %v3957_v9, %v7897_v5  ;;  %v4405_v23 = vrot.slane %v7639_v57, 5  ;;  %v3940_v25 = vsel %vm6518_vm4, %v3935_v41, %v3939_v6  ;;  %v6313_v11 = vld [vmem:[%s6492_s9 + $0x20] sm:$0x1] }
 0x123   : > { %v5428_v3 = vcombine.low %v7894_v22, %v7903_v44  ;;  %v4325_v56 = vrot.slane %v6312_v16, 5  ;;  %v7929_v31 = vsel %vm6744_vm7, %v5412_v61, %v4402_v49  ;;  %v4404_v51 = vrot.slane %v4402_v49, 4  ;;  %v5398_v49 = vld [vmem:[%s6492_s9 + $0xb4] sm:$0xe] }
 0x124   : > { %v5366_v7 = vcombine.low %v3906_v63, %v3916_v2  ;;  %v3959_v17 = vrot.slane %v3958_v43, 4  ;;  %v5413_v41 = vrot.slane %v5397_v28, 9  ;;  %v4409_v6 = vrot.slane %v7642_v34, 5  ;;  %v5386_v2 = vld [vmem:[%s6492_s9 + $0x24] sm:$0xe] }
 0x125   : > { %5871 = vmatmul.mubr.msk.bf16.gmra.mrb[20].mxu0 %vm656_vm3, %v7741_v24  ;;  %v3948_v24 = vor.u32 %v3947_v18, %v3944_v30  ;;  %v7934_v57 = vsel %vm6744_vm7, %v4404_v51, %v4405_v23  ;;  %v6264_v30 = vld [vmem:[%s6492_s9 + $0x54] sm:$0xff]   ;;  %v5401_v18 = vrot.slane %v5385_v62, 9  ;;  %v4327_v9 = vrot.slane %v4325_v56, 4  ;;  %v6316_v28 = vld [vmem:[%s6492_s9 + $0x2c] sm:$0x1] }
 0x126   : > { %5719 = vmatmul.mubr.msk.bf16.gmra.mrb[4].mxu1 %vm656_vm3, %v6261_v29  ;;  %5874 = vmatprep.mubr.msk.bf16.mxu0 %vm656_vm3, %v5365_v46  ;;  %v3963_v46 = vrot.slane %v3961_v50, 5  ;;  %v5367_v29 = vcombine.low %v3930_v4, %v3940_v25  ;;  %v5429_v8 = vcombine.low %v7929_v31, %v7934_v57  ;;  %v4412_v63 = vrot.slane %v7652_v48, 5  ;;  %v6314_v50 = vld [vmem:[%s6492_s9 + $0x28] sm:$0xf]  ;;  %v5387_v25 = vld [vmem:[%s6492_s9 + $0x30] sm:$0xe] }
 0x127   : > { %5722 = vmatprep.mubr.msk.bf16.mxu1 %vm656_vm3, %v6262_v19  ;;  %v3949_v12 = vrot.slane %v3948_v24, 4  ;;  %v4328_v19 = vrot.slane %v6313_v11, 5  ;;  %v4332_v61 = vrot.slane %v6314_v50, 5  ;;  %v7957_v48 = vsel %vm6744_vm7, %v5413_v41, %v4409_v6  ;;  %v6266_v11 = vld [vmem:[%s6492_s9 + $0x6c] sm:$0xff]   ;;  %v5399_v50 = vld [vmem:[%s6492_s9 + $0xc0] sm:$0xe] }
 0x128   : > { %v3964_v34 = vsel %vm6518_vm4, %v3959_v17, %v3963_v46  ;;  %v4411_v24 = vrot.slane %v4409_v6, 4  ;;  %v4326_v43 = vsel %vm6744_vm7, %v5401_v18, %v4325_v56  ;;  %v5402_v51 = vrot.slane %v5386_v2, 9  ;;  %v8376_v41 = vld [vmem:[#allocation9_spill] sm:$0xff]  ;;  %v6330_v31 = vld [vmem:[%s6492_s9 + $0xc8] sm:$0x1] }
 0x129   : > { %v3954_v4 = vsel %vm6518_vm4, %v3949_v12, %v7897_v5  ;;  %v4329_v23 = vsel %vm6744_vm7, %v4327_v9, %v4328_v19  ;;  %v6315_v5 = vld [vmem:[%s6492_s9 + $0x34] sm:$0xf]  ;;  %v6265_v12 = vld [vmem:[%s6492_s9 + $0x60] sm:$0xff]   ;;  %v5403_v18 = vrot.slane %v5387_v25, 9  ;;  %v4419_v9 = vrot.slane %v7766_v35, 5 }
 0x12a   : > { %v4339_v16 = vrot.slane %v6315_v5, 5  ;;  %v7968_v62 = vsel %vm6744_vm7, %v4411_v24, %v4412_v63  ;;  %v5368_v46 = vcombine.low %v3954_v4, %v3964_v34  ;;  %v5418_v17 = vcombine.low %v4326_v43, %v4329_v23  ;;  %v5388_v24 = vld [vmem:[%s6492_s9 + $0x3c] sm:$0xe] }
 0x12b   : > { %v5430_v56 = vcombine.low %v7957_v48, %v7968_v62  ;;  %v4342_v6 = vrot.slane %v8376_v41, 5  ;;  %v4333_v35 = vsel %vm6744_vm7, %v5402_v51, %v4332_v61  ;;  %v5415_v5 = vrot.slane %v5399_v50, 9 }
 0x12c   : > { %v4341_v19 = vrot.slane %v4339_v16, 4  ;;  %v4340_v23 = vsel %vm6744_vm7, %v5403_v18, %v4339_v16  ;;  %v4426_v51 = vrot.slane %v7859_v52, 5  ;;  %v2406_v57 = vshll.u32 %v6330_v31, 16 }
 0x12d   : > { %5875 = vmatmul.mubr.msk.bf16.gmra.mrb[24].mxu0 %vm656_vm3, %v5366_v7  ;;  %v5414_v7 = vrot.slane %v5398_v49, 9 }
 0x12e   : > { %5723 = vmatmul.mubr.msk.bf16.gmra.mrb[8].mxu1 %vm656_vm3, %v6263_v47  ;;  %5878 = vmatprep.mubr.msk.bf16.mxu0 %vm656_vm3, %v5367_v29  ;;  %v4335_v47 = vrot.slane %v6316_v28, 5  ;;  %v4416_v29 = vrot.slane %v7717_v39, 5  ;;  %v8377_v39 = vld [vmem:[#allocation10_spill] sm:$0xff]  ;;  %v4343_v25 = vsel %vm6744_vm7, %v4341_v19, %v4342_v6  ;;  %v5404_v28 = vrot.slane %v5388_v24, 9 }
 0x12f   : > { %5726 = vmatprep.mubr.msk.bf16.mxu1 %vm656_vm3, %v6264_v30  ;;  %v4334_v30 = vrot.slane %v4332_v61, 4  ;;  %v4346_v49 = vrot.slane %v8377_v39, 5  ;;  %v4423_v61 = vrot.slane %v7769_v58, 5  ;;  %v6317_v39 = vld [vmem:[%s6492_s9 + $0x70] sm:$0xf]  ;;  %v4430_v24 = vrot.slane %v7845_v55, 5 }
 0x130   : > { %v7980_v63 = vsel %vm6744_vm7, %v5414_v7, %v4416_v29  ;;  %v4418_v2 = vrot.slane %v4416_v29, 4  ;;  %v5117_v7 = vld [vmem:[%s6492_s9 + $0x6c] sm:$0xf]  ;;  %v8378_v29 = vld [vmem:[#allocation11_spill] sm:$0xff] }
 0x131   : > { %v4336_v34 = vsel %vm6744_vm7, %v4334_v30, %v4335_v47  ;;  %v4348_v47 = vrot.slane %v4346_v49, 4  ;;  %v6267_v30 = vld [vmem:[%s6492_s9 + $0x78] sm:$0xff]   ;;  %v8011_v16 = vsel %vm6744_vm7, %v5415_v5, %v4423_v61  ;;  %v4425_v18 = vrot.slane %v4423_v61, 4 }
 0x132   : > { %v7987_v4 = vsel %vm6744_vm7, %v4418_v2, %v4419_v9  ;;  %v5420_v9 = vcombine.low %v4340_v23, %v4343_v25  ;;  %v2219_v19 = vshrl.u32 %v5117_v7, 16  ;;  %v2222_v41 = vshll.u32 %v5117_v7, 16 }
 0x133   : > { %v5431_v43 = vcombine.low %v7980_v63, %v7987_v4  ;;  %v8016_v58 = vsel %vm6744_vm7, %v4425_v18, %v4426_v51  ;;  %v4347_v6 = vsel %vm6744_vm7, %v5404_v28, %v4346_v49  ;;  %v4433_v49 = vrot.slane %v7890_v21, 5  ;;  %v6269_v51 = vld [vmem:[%s6492_s9 + $0x90] sm:$0xff]   ;;  %v6270_v21 = vld [vmem:[%s6492_s9 + $0x9c] sm:$0xff]  }
 0x134   : > { %v5432_v50 = vcombine.low %v8011_v16, %v8016_v58  ;;  %v2221_v23 = vrot.slane %v2219_v19, 4  ;;  %v2224_v25 = vrot.slane %v2222_v41, 5  ;;  %v4432_v7 = vrot.slane %v4430_v24, 4 }
 0x135   : > { %5879 = vmatmul.mubr.msk.bf16.gmra.mrb[28].mxu0 %vm656_vm3, %v5368_v46  ;;  %v5419_v46 = vcombine.low %v4333_v35, %v4336_v34  ;;  %v2228_v35 = vshll.u32 %v6317_v39, 16  ;;  %v2232_v34 = vshrl.u32 %v6317_v39, 16 }
 0x136   : > { %5727 = vmatmul.mubr.msk.bf16.gmra.mrb[12].mxu1 %vm656_vm3, %v6265_v12  ;;  %5884 = vmatprep.mubr.msk.bf16.mxu0 %vm656_vm3, %v5418_v17  ;;  %v4349_v12 = vrot.slane %v8378_v29, 5  ;;  %v5400_v17 = vld [vmem:[%s6492_s9 + $0xcc] sm:$0xe]  ;;  %v8038_v55 = vsel %vm6744_vm7, %v4432_v7, %v4433_v49 }
 0x137   : > { %5730 = vmatprep.mubr.msk.bf16.mxu1 %vm656_vm3, %v6266_v11  ;;  %v6268_v11 = vld [vmem:[%s6492_s9 + $0x84] sm:$0xff]   ;;  %v5416_v52 = vrot.slane %v5400_v17, 9  ;;  %v2234_v28 = vrot.slane %v2232_v34, 4  ;;  %v6318_v17 = vld [vmem:[%s6492_s9 + $0x74] sm:$0x1] }
 0x138   : > { %v4350_v2 = vsel %vm6744_vm7, %v4348_v47, %v4349_v12  ;;  %v5123_v47 = vld [vmem:[%s6492_s9 + $0x84] sm:$0xf]  ;;  %v2225_v12 = vor.u32 %v2224_v25, %v2221_v23  ;;  %v6272_v34 = vld [vmem:[%s6492_s9 + $0xb4] sm:$0xff]  }
 0x139   : > { %v8033_v5 = vsel %vm6744_vm7, %v5416_v52, %v4430_v24  ;;  %v5421_v61 = vcombine.low %v4347_v6, %v4350_v2  ;;  %v2270_v18 = vshll.u32 %v5123_v47, 16  ;;  %v5126_v6 = vld [vmem:[%s6492_s9 + $0x90] sm:$0xf]  ;;  %v6271_v2 = vld [vmem:[%s6492_s9 + $0xa8] sm:$0xff]  }
 0x13a   : > { %v5433_v29 = vcombine.low %v8033_v5, %v8038_v55  ;;  %v2226_v52 = vrot.slane %v2225_v12, 4  ;;  %v2291_v23 = vshrl.u32 %v5126_v6, 16  ;;  %v2294_v25 = vshll.u32 %v5126_v6, 16 }
 0x13b   : > { %v2324_v12 = vshll.u32 %v6321_v60, 16 }
 0x13c   : > { %v2296_v14 = vrot.slane %v2294_v25, 5  ;;  %v6324_v25 = vld [vmem:[%s6492_s9 + $0xa4] sm:$0x1] }
 0x13d   : > { %5885 = vmatmul.mubr.msk.bf16.vlgmr.msra.gmra.mrb[0].mxu0 %vm656_vm3, %v5419_v46  ;;  %v2230_v46 = vrot.slane %v2228_v35, 5  ;;  %v5129_v35 = vld [vmem:[%s6492_s9 + $0x9c] sm:$0xf]  ;;  %v8080_v6 = vrot.slane %v2324_v12, 5 }
 0x13e   : > { %5731 = vmatmul.mubr.msk.bf16.gmra.mrb[16].mxu1 %vm656_vm3, %v6267_v30  ;;  %5888 = vmatprep.mubr.msk.bf16.mxu0 %vm656_vm3, %v5420_v9  ;;  %v2238_v30 = vshll.u32 %v6318_v17, 16  ;;  %v2267_v9 = vshrl.u32 %v5123_v47, 16  ;;  %v2318_v47 = vshll.u32 %v5129_v35, 16  ;;  %v6322_v17 = vld [vmem:[%s6492_s9 + $0x8c] sm:$0x1] }
 0x13f   : > { %5734 = vmatprep.mubr.msk.bf16.mxu1 %vm656_vm3, %v6268_v11  ;;  %v2235_v13 = vor.u32 %v2234_v28, %v2230_v46  ;;  %v6319_v11 = vld [vmem:[%s6492_s9 + $0x88] sm:$0xf]  ;;  %v2231_v7 = vsel %vm6518_vm4, %v2226_v52, %v2230_v46 }
 0x140   : > { %v2276_v19 = vshll.u32 %v6319_v11, 16  ;;  %v2280_v41 = vshrl.u32 %v6319_v11, 16  ;;  %v2240_v0 = vrot.slane %v2238_v30, 5  ;;  %v2269_v36 = vrot.slane %v2267_v9, 4 }
 0x141   : > { %v2236_v39 = vrot.slane %v2235_v13, 4  ;;  %v2286_v30 = vshll.u32 %v6322_v17, 16  ;;  %v2293_v9 = vrot.slane %v2291_v23, 4  ;;  %v2320_v11 = vrot.slane %v2318_v47, 5 }
 0x142   : > { %v8057_v24 = vrot.slane %v2276_v19, 5  ;;  %v2282_v49 = vrot.slane %v2280_v41, 4  ;;  %v6273_v19 = vld [vmem:[%s6492_s9 + $0xc0] sm:$0xff]  }
 0x143   : > { %v2241_v46 = vsel %vm6518_vm4, %v2236_v39, %v2240_v0  ;;  %v5132_v39 = vld [vmem:[%s6492_s9 + $0xa8] sm:$0xf] }
 0x144   : > { %v2283_v13 = vor.u32 %v2282_v49, %v8057_v24  ;;  %v5150_v41 = vcombine.low %v2231_v7, %v2241_v46  ;;  %v2334_v7 = vshll.u32 %v6324_v25, 16  ;;  %v2342_v45 = vshll.u32 %v5132_v39, 16 }
 0x145   : > { %5889 = vmatmul.mubr.msk.bf16.gmra.mrb[4].mxu0 %vm656_vm3, %v5421_v61  ;;  %v6320_v61 = vld [vmem:[%s6492_s9 + $0x94] sm:$0xf] }
 0x146   : > { %5735 = vmatmul.mubr.msk.bf16.gmra.mrb[20].mxu1 %vm656_vm3, %v6269_v51  ;;  %5892 = vmatprep.mubr.msk.bf16.mxu0 %vm656_vm3, %v5422_v10  ;;  %v2272_v10 = vrot.slane %v2270_v18, 5  ;;  %v2300_v51 = vshll.u32 %v6320_v61, 16  ;;  %v2304_v28 = vshrl.u32 %v6320_v61, 16  ;;  %v2284_v0 = vrot.slane %v2283_v13, 4 }
 0x147   : > { %5738 = vmatprep.mubr.msk.bf16.mxu1 %vm656_vm3, %v6270_v21  ;;  %v2315_v21 = vshrl.u32 %v5129_v35, 16  ;;  %v6323_v35 = vld [vmem:[%s6492_s9 + $0x98] sm:$0x1]  ;;  %v2339_v61 = vshrl.u32 %v5132_v39, 16  ;;  %v5138_v39 = vld [vmem:[%s6492_s9 + $0xc0] sm:$0xf] }
 0x148   : > { %v2273_v15 = vor.u32 %v2272_v10, %v2269_v36  ;;  %v8077_v26 = vrot.slane %v2300_v51, 5  ;;  %v2288_v36 = vrot.slane %v2286_v30, 5  ;;  %v2297_v10 = vor.u32 %v2296_v14, %v2293_v9  ;;  %v5135_v51 = vld [vmem:[%s6492_s9 + $0xb4] sm:$0xf] }
 0x149   : > { %v2317_v18 = vrot.slane %v2315_v21, 4  ;;  %v2352_v21 = vshrl.u32 %v6325_v27, 16  ;;  %v2363_v20 = vshrl.u32 %v5135_v51, 16  ;;  %v2366_v42 = vshll.u32 %v5135_v51, 16 }
 0x14a   : > { %v2274_v52 = vrot.slane %v2273_v15, 4  ;;  %v2289_v46 = vsel %vm6518_vm4, %v2284_v0, %v2288_v36  ;;  %v2298_v15 = vrot.slane %v2297_v10, 4  ;;  %v2336_v30 = vrot.slane %v2334_v7, 5 }
 0x14b   : > { %v2321_v23 = vor.u32 %v2320_v11, %v2317_v18  ;;  %v2341_v9 = vrot.slane %v2339_v61, 4  ;;  %v2354_v11 = vrot.slane %v2352_v21, 4  ;;  %v6329_v61 = vld [vmem:[%s6492_s9 + $0xbc] sm:$0x1] }
 0x14c   : > { %v2279_v47 = vsel %vm6518_vm4, %v2274_v52, %v8057_v24  ;;  %v2303_v0 = vsel %vm6518_vm4, %v2298_v15, %v8077_v26  ;;  %v2382_v22 = vshll.u32 %v6329_v61, 16 }
 0x14d   : > { %5893 = vmatmul.mubr.msk.bf16.gmra.mrb[8].mxu0 %vm656_vm3, %v5423_v40  ;;  %v2328_v40 = vshrl.u32 %v6321_v60, 16  ;;  %v2322_v17 = vrot.slane %v2321_v23, 4  ;;  %v5152_v24 = vcombine.low %v2279_v47, %v2289_v46 }
 0x14e   : > { %5739 = vmatmul.mubr.msk.bf16.gmra.mrb[24].mxu1 %vm656_vm3, %v6271_v2  ;;  %5896 = vmatprep.mubr.msk.bf16.mxu0 %vm656_vm3, %v5424_v54  ;;  %v2306_v54 = vrot.slane %v2304_v28, 4 }
 0x14f   : > { %5742 = vmatprep.mubr.msk.bf16.mxu1 %vm656_vm3, %v6272_v34  ;;  %v2330_v2 = vrot.slane %v2328_v40, 4  ;;  %v2310_v34 = vshll.u32 %v6323_v35, 16  ;;  %v2327_v10 = vsel %vm6518_vm4, %v2322_v17, %v8080_v6  ;;  %v2408_v17 = vrot.slane %v2406_v57, 5 }
 0x150   : > { %v2307_v49 = vor.u32 %v2306_v54, %v8077_v26  ;;  %v2344_v54 = vrot.slane %v2342_v45, 5  ;;  %v6327_v26 = vld [vmem:[%s6492_s9 + $0xb0] sm:$0x1] }
 0x151   : > { %v2331_v28 = vor.u32 %v2330_v2, %v8080_v6  ;;  %v2312_v60 = vrot.slane %v2310_v34, 5  ;;  %v2358_v35 = vshll.u32 %v6327_v26, 16  ;;  %v2387_v34 = vshrl.u32 %v5138_v39, 16 }
 0x152   : > { %v2308_v13 = vrot.slane %v2307_v49, 4  ;;  %v2345_v38 = vor.u32 %v2344_v54, %v2341_v9  ;;  %v2390_v6 = vshll.u32 %v5138_v39, 16  ;;  %v6328_v49 = vld [vmem:[%s6492_s9 + $0xc4] sm:$0xf] }
 0x153   : > { %v2332_v14 = vrot.slane %v2331_v28, 4  ;;  %v2396_v23 = vshll.u32 %v6328_v49, 16  ;;  %v2400_v25 = vshrl.u32 %v6328_v49, 16  ;;  %v2360_v45 = vrot.slane %v2358_v35, 5 }
 0x154   : > { %v2313_v36 = vsel %vm6518_vm4, %v2308_v13, %v2312_v60  ;;  %v2346_v51 = vrot.slane %v2345_v38, 4  ;;  %v2384_v60 = vrot.slane %v2382_v22, 5 }
 0x155   : > { %5897 = vmatmul.mubr.msk.bf16.gmra.mrb[12].mxu0 %vm656_vm3, %v5425_v53  ;;  %v2348_v53 = vshll.u32 %v6325_v27, 16  ;;  %v2337_v59 = vsel %vm6518_vm4, %v2332_v14, %v2336_v30  ;;  %v5153_v44 = vcombine.low %v2303_v0, %v2313_v36  ;;  %v2389_v27 = vrot.slane %v2387_v34, 4 }
 0x156   : > { %5743 = vmatmul.mubr.msk.bf16.gmra.mrb[28].mxu1 %vm656_vm3, %v6273_v19  ;;  %5900 = vmatprep.mubr.msk.bf16.mxu0 %vm656_vm3, %v5426_v33  ;;  %v6326_v33 = vld [vmem:[%s6492_s9 + $0xb8] sm:$0xf]  ;;  %v2365_v19 = vrot.slane %v2363_v20, 4  ;;  %v2398_v21 = vrot.slane %v2396_v23, 5  ;;  %v2402_v47 = vrot.slane %v2400_v25, 4  ;;  %s4912_s9 = sshll.u32 %s161_s6, 8 }
 0x157   : > { %5764 = vmatprep.mubr.msk.bf16.mxu1 %vm656_vm3, %v5150_v41  ;;  %v2372_v12 = vshll.u32 %v6326_v33, 16  ;;  %v2376_v40 = vshrl.u32 %v6326_v33, 16  ;;  %v2350_v18 = vrot.slane %v2348_v53, 5  ;;  %v2368_v41 = vrot.slane %v2366_v42, 5  ;;  %s8188_s10 = scalar_lea.vmem [#allocation2], %s4912_s9 }
 0x158   : > { %v2392_v53 = vrot.slane %v2390_v6, 5  ;;  %s4846_s17 = sshll.u32 %s8188_s10, 4  ;;  %s8258_s17 = int_to_ptr.vmem [resolvable:$true] %s4846_s17 }
 0x159   : > { %v2374_v52 = vrot.slane %v2372_v12, 5  ;;  %v2378_v2 = vrot.slane %v2376_v40, 4  ;;  %v2351_v20 = vsel %vm6518_vm4, %v2346_v51, %v2350_v18  ;;  %v2403_v12 = vor.u32 %v2402_v47, %v2398_v21  ;;  %s6331_s25 = scalar_lea.vmem %s8258_s17, 4096  ;;  %p6338_p0 = scmp.lt.s32.totalorder %s8258_s17, %s6336_s27 }
 0x15a   : > { %v2393_v33 = vor.u32 %v2392_v53, %v2389_v27  ;;  %p6332_p11 = scmp.ne.s32.totalorder %s8258_s17, %s6331_s25  ;;  %p6339_p1 = scmp.lt.s32.totalorder %s6337_s28, %s6331_s25 }
 0x15b   : > { %v2379_v7 = vor.u32 %v2378_v2, %v2374_v52  ;;  %v2404_v13 = vrot.slane %v2403_v12, 4  ;;  %v8180_v2 = vld [vmem:[%s8308_s2] ss:$0 sm:$0xff] }
 0x15c   : > { %v2394_v40 = vrot.slane %v2393_v33, 4  ;;  %p6333_p12 = pnand %p6332_p11, %p6456_p5  ;;  %p6340_p2 = por %p6339_p1, %p6338_p0 }
 0x15d   : > { %5901 = vmatmul.mubr.msk.bf16.gmra.mrb[16].mxu0 %vm656_vm3, %v5427_v37  ;;  %v2355_v37 = vor.u32 %v2354_v11, %v2350_v18  ;;  %v2380_v15 = vrot.slane %v2379_v7, 4  ;;  %v2409_v9 = vsel %vm6518_vm4, %v2404_v13, %v2408_v17 }
 0x15e   : > { %5765 = vmatmul.mubr.msk.bf16.vlgmr.msra.gmra.mrb[16].mxu1 %vm656_vm3, %v7886_v1  ;;  %5904 = vmatprep.mubr.msk.bf16.mxu0 %vm656_vm3, %v5428_v3  ;;  %v2369_v1 = vor.u32 %v2368_v41, %v2365_v19  ;;  %v5154_v3 = vcombine.low %v2327_v10, %v2337_v59  ;;  %v2399_v30 = vsel %vm6518_vm4, %v2394_v40, %v2398_v21  ;;  %p6334_p13 = pneg %p6333_p12 }
 0x15f   : > { %5768 = vmatprep.mubr.msk.bf16.mxu1 %vm656_vm3, %v5152_v24  ;;  %v2356_v28 = vrot.slane %v2355_v37, 4  ;;  %v2385_v48 = vsel %vm6518_vm4, %v2380_v15, %v2384_v60  ;;  %v5157_v14 = vcombine.low %v2399_v30, %v2409_v9 }
 0x160   : > { %v2370_v46 = vrot.slane %v2369_v1, 4  ;;  %p6341_p3 = pnand %p6340_p2, %p6334_p13 }
 0x161   : > { %v2361_v42 = vsel %vm6518_vm4, %v2356_v28, %v2360_v45 }
 0x162   : > { %v5155_v62 = vcombine.low %v2351_v20, %v2361_v42 }
 0x165   : > { %5905 = vmatmul.mubr.msk.bf16.gmra.mrb[20].mxu0 %vm656_vm3, %v5429_v8  ;;  %v2375_v8 = vsel %vm6518_vm4, %v2370_v46, %v2374_v52 }
 0x166   : > { %5769 = vmatmul.mubr.msk.bf16.gmra.mrb[20].mxu1 %vm656_vm3, %v5153_v44  ;;  %5908 = vmatprep.mubr.msk.bf16.mxu0 %vm656_vm3, %v5430_v56  ;;  %v5156_v56 = vcombine.low %v2375_v8, %v2385_v48 }
 0x167   : > { %5772 = vmatprep.mubr.msk.bf16.mxu1 %vm656_vm3, %v5154_v3 }
 0x16d   : > { %5909 = vmatmul.mubr.msk.bf16.gmra.mrb[24].mxu0 %vm656_vm3, %v5431_v43 }
 0x16e   : > { %5773 = vmatmul.mubr.msk.bf16.gmra.mrb[24].mxu1 %vm656_vm3, %v5155_v62  ;;  %5912 = vmatprep.mubr.msk.bf16.mxu0 %vm656_vm3, %v5432_v50 }
 0x16f   : > { %5776 = vmatprep.mubr.msk.bf16.mxu1 %vm656_vm3, %v5156_v56 }
 0x175   : > { %5913 = vmatmul.mubr.msk.bf16.gmra.mrb[28].mxu0 %vm656_vm3, %v5433_v29 }
 0x176   : > { %5777 = vmatmul.mubr.msk.bf16.gmra.mrb[28].mxu1 %vm656_vm3, %v5157_v14 }
 0x1f1   : > { %v5716_v63 = vpop.f32.mrb[0].mxu1 }
 0x1f2   : > { %v1819_v4 = vpop.f32.mrb[1].mxu1 }
 0x1f3   : > { %v5717_v43 = vpop.f32.mrb[2].mxu1 }
 0x1f4   : > { %v1822_v16 = vpop.f32.mrb[3].mxu1 }
 0x1f9   : > { %v5720_v58 = vpop.f32.mrb[4].mxu1 }
 0x1fa   : > { %v1835_v50 = vpop.f32.mrb[5].mxu1 }
 0x1fb   : > { %v5721_v54 = vpop.f32.mrb[6].mxu1 }
 0x1fc   : > { %v1838_v18 = vpop.f32.mrb[7].mxu1 }
 0x201   : > { %v5724_v32 = vpop.f32.mrb[8].mxu1 }
 0x202   : > { %v1851_v11 = vpop.f32.mrb[9].mxu1 }
 0x203   : > { %v5725_v24 = vpop.f32.mrb[10].mxu1 }
 0x204   : > { %v1854_v19 = vpop.f32.mrb[11].mxu1 }
 0x209   : > { %v8168_v41 = vpop.f32.mrb[12].mxu1 }
 0x20a   : > { %v8170_v5 = vpop.f32.mrb[13].mxu1 }
 0x20b   : > { %v8172_v55 = vpop.f32.mrb[14].mxu1 }
 0x20c   : > { %v8174_v29 = vpop.f32.mrb[15].mxu1 }
 0x210   : > { %v5886_v52 = vpop.f32.mrb[0].mxu0 }
 0x211   : > { %v5918_v39 = vadd.f32 %v5886_v52, %v5716_v63  ;;  %v4570_v0 = vpop.f32.mrb[1].mxu0 }
 0x212   : > { %v5919_v36 = vadd.f32 %v4570_v0, %v1819_v4  ;;  %v5887_v10 = vpop.f32.mrb[2].mxu0 }
 0x213   : > { %v4738_v59 = vadd.f32 %v5918_v39, %v8180_v2  ;;  %v5920_v38 = vadd.f32 %v5887_v10, %v5717_v43  ;;  %v4573_v37 = vpop.f32.mrb[3].mxu0 }
 0x214   : > { %v4736_v26 = vadd.f32 %v5919_v36, %v8180_v2  ;;  %v5921_v35 = vadd.f32 %v4573_v37, %v1822_v16 }
 0x215   : > { %v4770_v34 = vmax.f32 %v4738_v59, 0.0  ;;  %v4739_v6 = vadd.f32 %v5920_v38, %v8180_v2 }
 0x216   : > { %v4768_v49 = vmax.f32 %v4736_v26, 0.0  ;;  %v4737_v23 = vadd.f32 %v5921_v35, %v8180_v2 }
 0x217   : > { %4802 = vst [vmem:[%s8188_s10 + $0x10] sm:$0xff] %v4770_v34  ;;  %v4771_v25 = vmax.f32 %v4739_v6, 0.0 }
 0x218   : > { %4800 = vst [vmem:[%s8188_s10] sm:$0xff] %v4768_v49  ;;  %v4769_v1 = vmax.f32 %v4737_v23, 0.0  ;;  %v5890_v7 = vpop.f32.mrb[4].mxu0 }
 0x219   : > { %4803 = vst [vmem:[%s8188_s10 + $0x18] sm:$0xff] %v4771_v25  ;;  %v5922_v61 = vadd.f32 %v5890_v7, %v5720_v58  ;;  %v4586_v22 = vpop.f32.mrb[5].mxu0 }
 0x21a   : > { %4801 = vst [vmem:[%s8188_s10 + $0x8] sm:$0xff] %v4769_v1  ;;  %v5923_v44 = vadd.f32 %v4586_v22, %v1835_v50  ;;  %v5891_v3 = vpop.f32.mrb[6].mxu0 }
 0x21b   : > { %v4742_v51 = vadd.f32 %v5922_v61, %v8180_v2  ;;  %v5924_v28 = vadd.f32 %v5891_v3, %v5721_v54  ;;  %v4589_v45 = vpop.f32.mrb[7].mxu0 }
 0x21c   : > { %v4740_v27 = vadd.f32 %v5923_v44, %v8180_v2  ;;  %v5925_v53 = vadd.f32 %v4589_v45, %v1838_v18 }
 0x21d   : > { %v4774_v21 = vmax.f32 %v4742_v51, 0.0  ;;  %v4743_v47 = vadd.f32 %v5924_v28, %v8180_v2 }
 0x21e   : > { %v4772_v46 = vmax.f32 %v4740_v27, 0.0  ;;  %v4741_v15 = vadd.f32 %v5925_v53, %v8180_v2 }
 0x21f   : > { %4806 = vst [vmem:[%s8188_s10 + $0x30] sm:$0xff] %v4774_v21  ;;  %v4775_v60 = vmax.f32 %v4743_v47, 0.0 }
 0x220   : > { %4804 = vst [vmem:[%s8188_s10 + $0x20] sm:$0xff] %v4772_v46  ;;  %v4773_v20 = vmax.f32 %v4741_v15, 0.0  ;;  %v5894_v42 = vpop.f32.mrb[8].mxu0 }
 0x221   : > { %4807 = vst [vmem:[%s8188_s10 + $0x38] sm:$0xff] %v4775_v60  ;;  %v5926_v33 = vadd.f32 %v5894_v42, %v5724_v32  ;;  %v4602_v12 = vpop.f32.mrb[9].mxu0 }
 0x222   : > { %4805 = vst [vmem:[%s8188_s10 + $0x28] sm:$0xff] %v4773_v20  ;;  %v5927_v31 = vadd.f32 %v4602_v12, %v1851_v11  ;;  %v5895_v57 = vpop.f32.mrb[10].mxu0 }
 0x223   : > { %v4746_v8 = vadd.f32 %v5926_v33, %v8180_v2  ;;  %v5928_v48 = vadd.f32 %v5895_v57, %v5725_v24  ;;  %v4605_v62 = vpop.f32.mrb[11].mxu0 }
 0x224   : > { %v4744_v56 = vadd.f32 %v5927_v31, %v8180_v2  ;;  %v5929_v40 = vadd.f32 %v4605_v62, %v1854_v19 }
 0x225   : > { %v4778_v13 = vmax.f32 %v4746_v8, 0.0  ;;  %v4747_v17 = vadd.f32 %v5928_v48, %v8180_v2 }
 0x226   : > { %v4776_v30 = vmax.f32 %v4744_v56, 0.0  ;;  %v4745_v9 = vadd.f32 %v5929_v40, %v8180_v2 }
 0x227   : > { %4810 = vst [vmem:[%s8188_s10 + $0x50] sm:$0xff] %v4778_v13  ;;  %v4779_v14 = vmax.f32 %v4747_v17, 0.0 }
 0x228   : > { %4808 = vst [vmem:[%s8188_s10 + $0x40] sm:$0xff] %v4776_v30  ;;  %v4777_v63 = vmax.f32 %v4745_v9, 0.0  ;;  %v5898_v4 = vpop.f32.mrb[12].mxu0 }
 0x229   : > { %4811 = vst [vmem:[%s8188_s10 + $0x58] sm:$0xff] %v4779_v14  ;;  %v5930_v43 = vadd.f32 %v5898_v4, %v8168_v41  ;;  %v4618_v16 = vpop.f32.mrb[13].mxu0 }
 0x22a   : > { %4809 = vst [vmem:[%s8188_s10 + $0x48] sm:$0xff] %v4777_v63  ;;  %v5931_v58 = vadd.f32 %v4618_v16, %v8170_v5  ;;  %v5899_v50 = vpop.f32.mrb[14].mxu0 }
 0x22b   : > { %v4750_v54 = vadd.f32 %v5930_v43, %v8180_v2  ;;  %v5932_v18 = vadd.f32 %v5899_v50, %v8172_v55  ;;  %v4621_v32 = vpop.f32.mrb[15].mxu0 }
 0x22c   : > { %v4748_v11 = vadd.f32 %v5931_v58, %v8180_v2  ;;  %v5933_v24 = vadd.f32 %v4621_v32, %v8174_v29 }
 0x22d   : > { %v4782_v19 = vmax.f32 %v4750_v54, 0.0  ;;  %v4751_v41 = vadd.f32 %v5932_v18, %v8180_v2 }
 0x22e   : > { %v4780_v52 = vmax.f32 %v4748_v11, 0.0  ;;  %v4749_v39 = vadd.f32 %v5933_v24, %v8180_v2 }
 0x22f   : > { %4814 = vst [vmem:[%s8188_s10 + $0x70] sm:$0xff] %v4782_v19  ;;  %v4783_v5 = vmax.f32 %v4751_v41, 0.0 }
 0x230   : > { %4812 = vst [vmem:[%s8188_s10 + $0x60] sm:$0xff] %v4780_v52  ;;  %v4781_v0 = vmax.f32 %v4749_v39, 0.0  ;;  %v5902_v36 = vpop.f32.mrb[16].mxu0 }
 0x231   : > { %4815 = vst [vmem:[%s8188_s10 + $0x78] sm:$0xff] %v4783_v5  ;;  %v5766_v10 = vpop.f32.mrb[16].mxu1  ;;  %v4634_v55 = vpop.f32.mrb[17].mxu0 }
 0x232   : > { %4813 = vst [vmem:[%s8188_s10 + $0x68] sm:$0xff] %v4781_v0  ;;  %v5934_v59 = vadd.f32 %v5902_v36, %v5766_v10  ;;  %v2609_v38 = vpop.f32.mrb[17].mxu1  ;;  %v5903_v37 = vpop.f32.mrb[18].mxu0 }
 0x233   : > { %v5935_v29 = vadd.f32 %v4634_v55, %v2609_v38  ;;  %v5767_v26 = vpop.f32.mrb[18].mxu1  ;;  %v4637_v35 = vpop.f32.mrb[19].mxu0 }
 0x234   : > { %v4754_v34 = vadd.f32 %v5934_v59, %v8180_v2  ;;  %v5936_v6 = vadd.f32 %v5903_v37, %v5767_v26  ;;  %v2612_v49 = vpop.f32.mrb[19].mxu1 }
 0x235   : > { %v4752_v23 = vadd.f32 %v5935_v29, %v8180_v2  ;;  %v5937_v25 = vadd.f32 %v4637_v35, %v2612_v49 }
 0x236   : > { %v4786_v1 = vmax.f32 %v4754_v34, 0.0  ;;  %v4755_v7 = vadd.f32 %v5936_v6, %v8180_v2 }
 0x237   : > { %v4784_v61 = vmax.f32 %v4752_v23, 0.0  ;;  %v4753_v22 = vadd.f32 %v5937_v25, %v8180_v2 }
 0x238   : > { %4818 = vst [vmem:[%s8188_s10 + $0x90] sm:$0xff] %v4786_v1  ;;  %v4787_v44 = vmax.f32 %v4755_v7, 0.0  ;;  %v5906_v3 = vpop.f32.mrb[20].mxu0 }
 0x239   : > { %4816 = vst [vmem:[%s8188_s10 + $0x80] sm:$0xff] %v4784_v61  ;;  %v4785_v51 = vmax.f32 %v4753_v22, 0.0  ;;  %v5770_v28 = vpop.f32.mrb[20].mxu1  ;;  %v4650_v45 = vpop.f32.mrb[21].mxu0 }
 0x23a   : > { %4819 = vst [vmem:[%s8188_s10 + $0x98] sm:$0xff] %v4787_v44  ;;  %v5938_v27 = vadd.f32 %v5906_v3, %v5770_v28  ;;  %v2625_v53 = vpop.f32.mrb[21].mxu1  ;;  %v5907_v21 = vpop.f32.mrb[22].mxu0 }
 0x23b   : > { %4817 = vst [vmem:[%s8188_s10 + $0x88] sm:$0xff] %v4785_v51  ;;  %v5939_v47 = vadd.f32 %v4650_v45, %v2625_v53  ;;  %v5771_v46 = vpop.f32.mrb[22].mxu1  ;;  %v4653_v15 = vpop.f32.mrb[23].mxu0 }
 0x23c   : > { %v4758_v60 = vadd.f32 %v5938_v27, %v8180_v2  ;;  %v5940_v20 = vadd.f32 %v5907_v21, %v5771_v46  ;;  %v2628_v42 = vpop.f32.mrb[23].mxu1 }
 0x23d   : > { %v4756_v33 = vadd.f32 %v5939_v47, %v8180_v2  ;;  %v5941_v12 = vadd.f32 %v4653_v15, %v2628_v42 }
 0x23e   : > { %v4790_v31 = vmax.f32 %v4758_v60, 0.0  ;;  %v4759_v57 = vadd.f32 %v5940_v20, %v8180_v2 }
 0x23f   : > { %v4788_v8 = vmax.f32 %v4756_v33, 0.0  ;;  %v4757_v48 = vadd.f32 %v5941_v12, %v8180_v2 }
 0x240   : > { %4822 = vst [vmem:[%s8188_s10 + $0xb0] sm:$0xff] %v4790_v31  ;;  %v4791_v62 = vmax.f32 %v4759_v57, 0.0  ;;  %v5910_v56 = vpop.f32.mrb[24].mxu0 }
 0x241   : > { %4820 = vst [vmem:[%s8188_s10 + $0xa0] sm:$0xff] %v4788_v8  ;;  %v4789_v40 = vmax.f32 %v4757_v48, 0.0  ;;  %v5774_v13 = vpop.f32.mrb[24].mxu1  ;;  %v4666_v17 = vpop.f32.mrb[25].mxu0 }
 0x242   : > { %4823 = vst [vmem:[%s8188_s10 + $0xb8] sm:$0xff] %v4791_v62  ;;  %v5942_v30 = vadd.f32 %v5910_v56, %v5774_v13  ;;  %v2641_v9 = vpop.f32.mrb[25].mxu1  ;;  %v5911_v14 = vpop.f32.mrb[26].mxu0 }
 0x243   : > { %4821 = vst [vmem:[%s8188_s10 + $0xa8] sm:$0xff] %v4789_v40  ;;  %v5943_v63 = vadd.f32 %v4666_v17, %v2641_v9  ;;  %v5775_v4 = vpop.f32.mrb[26].mxu1  ;;  %v4669_v43 = vpop.f32.mrb[27].mxu0 }
 0x244   : > { %v4762_v16 = vadd.f32 %v5942_v30, %v8180_v2  ;;  %v5944_v58 = vadd.f32 %v5911_v14, %v5775_v4  ;;  %v2644_v50 = vpop.f32.mrb[27].mxu1 }
 0x245   : > { %v4760_v54 = vadd.f32 %v5943_v63, %v8180_v2  ;;  %v5945_v18 = vadd.f32 %v4669_v43, %v2644_v50 }
 0x246   : > { %v4794_v32 = vmax.f32 %v4762_v16, 0.0  ;;  %v4763_v11 = vadd.f32 %v5944_v58, %v8180_v2 }
 0x247   : > { %v4792_v24 = vmax.f32 %v4760_v54, 0.0  ;;  %v4761_v19 = vadd.f32 %v5945_v18, %v8180_v2 }
 0x248   : > { %4826 = vst [vmem:[%s8188_s10 + $0xd0] sm:$0xff] %v4794_v32  ;;  %v4795_v41 = vmax.f32 %v4763_v11, 0.0  ;;  %v5914_v52 = vpop.f32.mrb[28].mxu0 }
 0x249   : > { %4824 = vst [vmem:[%s8188_s10 + $0xc0] sm:$0xff] %v4792_v24  ;;  %v4793_v39 = vmax.f32 %v4761_v19, 0.0  ;;  %v5778_v5 = vpop.f32.mrb[28].mxu1  ;;  %v4682_v0 = vpop.f32.mrb[29].mxu0 }
 0x24a   : > { %4827 = vst [vmem:[%s8188_s10 + $0xd8] sm:$0xff] %v4795_v41  ;;  %v5946_v36 = vadd.f32 %v5914_v52, %v5778_v5  ;;  %v2657_v10 = vpop.f32.mrb[29].mxu1  ;;  %v5915_v55 = vpop.f32.mrb[30].mxu0 }
 0x24b   : > { %4825 = vst [vmem:[%s8188_s10 + $0xc8] sm:$0xff] %v4793_v39  ;;  %v5947_v59 = vadd.f32 %v4682_v0, %v2657_v10  ;;  %v5779_v38 = vpop.f32.mrb[30].mxu1  ;;  %v4685_v37 = vpop.f32.mrb[31].mxu0 }
 0x24c   : > { %v4766_v29 = vadd.f32 %v5946_v36, %v8180_v2  ;;  %v5948_v26 = vadd.f32 %v5915_v55, %v5779_v38  ;;  %v2660_v35 = vpop.f32.mrb[31].mxu1 }
 0x24d   : > { %v4764_v34 = vadd.f32 %v5947_v59, %v8180_v2  ;;  %v5949_v6 = vadd.f32 %v4685_v37, %v2660_v35 }
 0x24e   : > { %v4798_v49 = vmax.f32 %v4766_v29, 0.0  ;;  %v4767_v23 = vadd.f32 %v5948_v26, %v8180_v2 }
 0x24f   : > { %v4796_v25 = vmax.f32 %v4764_v34, 0.0  ;;  %v4765_v1 = vadd.f32 %v5949_v6, %v8180_v2 }
 0x250   : > { %4830 = vst [vmem:[%s8188_s10 + $0xf0] sm:$0xff] %v4798_v49  ;;  %v4799_v7 = vmax.f32 %v4767_v23, 0.0 }
 0x251   : > { %4828 = vst [vmem:[%s8188_s10 + $0xe0] sm:$0xff] %v4796_v25  ;;  %v4797_v61 = vmax.f32 %v4765_v1, 0.0 }
 0x252   : > { %4831 = vst [vmem:[%s8188_s10 + $0xf8] sm:$0xff] %v4799_v7 }
 0x253   : > { %4829 = vst [vmem:[%s8188_s10 + $0xe8] sm:$0xff] %v4797_v61 }
 0x254   : > { %6344 = shalt.err (!%p6341_p3)
}
 0x255   : > { %s6345_s29 = scalar_lea.hbm %s8256_s24, 4096  ;;  %s6349_s5 = scalar_lea.hbm %s8309_s3, 8192 }
 0x256   : > { %p6346_p4 = scmp.ne.s32.totalorder %s8256_s24, %s6345_s29  ;;  %p6350_p9 = scmp.lt.u32.totalorder %s8256_s24, %s8309_s3 }
 0x257   : > { %p6351_p10 = scmp.lt.u32.totalorder %s6349_s5, %s6345_s29  ;;  %p6353_p12 = scmp.lt.u32.totalorder %s6345_s29, %s8256_s24 }
 0x258   : > { %p6347_p7 = pnand %p6346_p4, %p6456_p5 }
 0x259   : > { %p6352_p11 = por %p6351_p10, %p6350_p9 }
 0x25a   : > { %p6348_p8 = pneg %p6347_p7 }
 0x25b   : > { %p6354_p13 = por %p6353_p12, %p6352_p11 }
 0x25d   : > { %p6355_p0 = pnand %p6354_p13, %p6348_p8 }
 0x25f   : > { %6358 = shalt.err (!%p6355_p0)
}
 0x260   : > { %s6396_s8 = smov 128   ;;  %s6397_s9 = smov 8  }
 0x261   : > { %6185 = dma.vmem_to_hbm [thread:$0]  (%p6456_p5), %s8258_s17, 4096, %s8256_s24, %s8265_s16, %s6396_s8, %s6396_s8, %s6397_s9  }
 0x262 PF: > { %p6191_p1 = scmp.ge.s32.totalorder %s6393_s15, 2  ;;  %s4861_s10 = sand.u32 1, %s6381_s12  }
 0x263   : > { %s4862_s11 = scalar_lea.sflag [#allocation3], %s4861_s10 }
 0x264   : > { %p6188_p2 = pnand %p6191_p1, %p6460_p6 }
 0x266   : > { %6376 = dma.done.wait (!%p6188_p2), %s4862_s11, 4096  }
 0x267   : > { %6378 = vsyncadd (!%p6188_p2), %s4862_s11, 4294963200  ;;  %p13_p3 = scmp.ge.s32.totalorder %s6443_s18, 4   ;;  %s8379_s12 = smov %s6385_s13 }
 0x268   : > { %s8380_s13 = smov %s6389_s14  ;;  %s8381_s14 = smov %s6454_s21 }
 0x269   : > { %s8382_s15 = smov %s6443_s18  ;;  %15 = sbr.rel (!%p13_p3) target bundleno = 3 (0x3), region = 77 }
 0x270   :  { %4867 = vsyncpa [#allocation3], 1 }
 0x271   :  { %4869 = vsyncpa [#allocation3 + $0x1], 1 }

</bundles_post_ra>
